<compile_context>
chip_gen: v5e
topology: v5e:2x2
jax: 0.10.0
libtpu: 0.0.40
codegen_flags: <defaults>
</compile_context>

<pallas_src>
import numpy as np
import jax
import jax.numpy as jnp
from jax.experimental import pallas as pl
from jax.experimental.pallas import tpu as pltpu


# ----------------------------------------------------------------------------
# Diffusion schedule buffers (plain numpy glue, same role as PyTorch __init__)
# ----------------------------------------------------------------------------
def cosine_beta_schedule(timesteps, s=0.008):
    # Nichol-Dhariwal cosine schedule (review correctness note).
    steps = timesteps + 1
    x = np.linspace(0, timesteps, steps)
    alphas_cumprod = np.cos(((x / timesteps) + s) / (1 + s) * np.pi * 0.5) ** 2
    alphas_cumprod = alphas_cumprod / alphas_cumprod[0]
    betas = 1.0 - (alphas_cumprod[1:] / alphas_cumprod[:-1])
    return np.clip(betas, 0.0, 0.999)


def make_buffers(timesteps=1000):
    betas = cosine_beta_schedule(timesteps)
    alphas = 1.0 - betas
    alphas_cumprod = np.cumprod(alphas, axis=0)
    return {
        "sqrt_alphas_cumprod": jnp.asarray(np.sqrt(alphas_cumprod), jnp.float32),
        "sqrt_one_minus_alphas_cumprod": jnp.asarray(
            np.sqrt(1.0 - alphas_cumprod), jnp.float32
        ),
        "num_timesteps": int(betas.shape[0]),
    }


# ----------------------------------------------------------------------------
# Synthetic denoise_fn / history_fn parameters + time embedding (glue)
# ----------------------------------------------------------------------------
T_DIM = 16      # time-embedding width
CCTX = 13       # context channels produced by the history_fn stand-in
VIDEO_C = 3
CIN = VIDEO_C + CCTX
HIDDEN = 32
COUT = 3


def init_params(key):
    ks = jax.random.split(key, 4)
    return {
        "wh": jax.random.normal(ks[0], (VIDEO_C, CCTX), jnp.float32) * 0.3,
        "bh": jnp.zeros((1, CCTX), jnp.float32),
        "w1": jax.random.normal(ks[1], (CIN, HIDDEN), jnp.float32) / np.sqrt(CIN),
        "w2": jax.random.normal(ks[2], (HIDDEN, COUT), jnp.float32) / np.sqrt(HIDDEN),
        "wt": jax.random.normal(ks[3], (T_DIM, HIDDEN), jnp.float32) * 0.1,
    }


def time_embedding(t, t_dim):
    half = t_dim // 2
    freqs = jnp.exp(-jnp.log(10000.0) * jnp.arange(half, dtype=jnp.float32) / (half - 1))
    args = t.astype(jnp.float32)[:, None] * freqs[None, :]
    return jnp.concatenate([jnp.sin(args), jnp.cos(args)], axis=-1)   # (B, t_dim)


# ----------------------------------------------------------------------------
# Fused Pallas kernel: q_sample + history(1x1 conv) + denoise MLP + L1 sum
# ----------------------------------------------------------------------------
def fused_kernel(sa_ref, soma_ref,              # SMEM (G,)  per-(frame,batch) scalars
                 x_ref, n_ref, c_ref,           # (ROW_TILE, C) data tiles
                 tb_ref,                        # (G, HIDDEN) resident time bias
                 wh_ref, bh_ref,                # history 1x1 conv weights
                 w1x_ref, w1c_ref, w2_ref,      # denoise MLP (w1 pre-split)
                 loss_ref):                     # SMEM (1,1) resident accumulator
    g = pl.program_id(0)                        # frame*batch index
    r = pl.program_id(1)                        # row tile within the frame

    @pl.when((g == 0) & (r == 0))
    def _init():
        loss_ref[0, 0] = jnp.float32(0.0)

    # history_fn stand-in: context = tanh(control @ Wh + bh)   (1x1 conv)
    ctx = jnp.tanh(
        jnp.dot(c_ref[...], wh_ref[...], preferred_element_type=jnp.float32)
        + bh_ref[...])

    # q_sample: per-(frame,batch) scalars read from SMEM, full-vreg saxpy
    noise = n_ref[...]
    x_noisy = sa_ref[g] * x_ref[...] + soma_ref[g] * noise

    # denoise_fn stand-in: split-w1 MLP (no concat), time bias broadcast in-kernel
    tb = tb_ref[pl.ds(g, 1), :]                                   # (1, HIDDEN)
    h = (jnp.dot(x_noisy, w1x_ref[...], preferred_element_type=jnp.float32)
         + jnp.dot(ctx, w1c_ref[...], preferred_element_type=jnp.float32)
         + tb)
    h = jax.nn.gelu(h, approximate=True)
    x_recon = jnp.dot(h, w2_ref[...], preferred_element_type=jnp.float32)

    # L1 partial sum accumulated into the resident SMEM scalar
    loss_ref[0, 0] += jnp.sum(jnp.abs(noise - x_recon))


def _pick_row_tile(hw):
    # Largest power-of-two (multiple of 8) tile dividing HW, capped at 1024 so
    # data tiles + double buffering stay far under v7x's 32 MiB scoped VMEM.
    for cand in (1024, 512, 256, 128, 64, 32, 16, 8):
        if hw % cand == 0:
            return cand
    return hw   # odd spatial sizes: fall back to the whole frame tile


def fused_diffusion_loss(video_rows, noise_rows, ctrl_rows,
                         sa_g, soma_g, tb_g, wh, bh, w1x, w1c, w2, *, hw):
    total_rows, c = video_rows.shape
    g_steps = sa_g.shape[0]
    assert total_rows == g_steps * hw
    row_tile = _pick_row_tile(hw)
    r_steps = hw // row_tile

    def data_spec():
        return pl.BlockSpec((row_tile, c), lambda g, r: (g * r_steps + r, 0))

    def resident(arr):
        # full-array block, constant index -> DMA'd once, stays in VMEM
        return pl.BlockSpec(arr.shape, lambda g, r: (0,) * arr.ndim)

    total = pl.pallas_call(
        fused_kernel,
        out_shape=jax.ShapeDtypeStruct((1, 1), jnp.float32),
        grid=(g_steps, r_steps),
        in_specs=[
            pl.BlockSpec(memory_space=pltpu.MemorySpace.SMEM),   # sa_g
            pl.BlockSpec(memory_space=pltpu.MemorySpace.SMEM),   # soma_g
            data_spec(),                                          # x_start rows
            data_spec(),                                          # noise rows
            data_spec(),                                          # control rows
            resident(tb_g),
            resident(wh), resident(bh),
            resident(w1x), resident(w1c), resident(w2),
        ],
        out_specs=pl.BlockSpec((1, 1), lambda g, r: (0, 0),
                               memory_space=pltpu.MemorySpace.SMEM),
        compiler_params=pltpu.CompilerParams(
            # the whole grid reduces into one scalar -> both axes "arbitrary"
            dimension_semantics=("arbitrary", "arbitrary")),
    )(sa_g, soma_g, video_rows, noise_rows, ctrl_rows,
      tb_g, wh, bh, w1x, w1c, w2)
    return total[0, 0]


# ----------------------------------------------------------------------------
# GaussianDiffusion.forward
# ----------------------------------------------------------------------------
def gaussian_diffusion_forward(batch, t, params, sqrt_alphas_cumprod,
                               sqrt_one_minus_alphas_cumprod, noise_key):
    # batch: (T, B, 6, H, W) float32, NCHW per frame; first 3 ch = control,
    # last 3 ch = video (as in the PyTorch module).
    control = batch[:, :, :3]
    video = batch[:, :, 3:]
    T, B, C, H, W = video.shape
    HW = H * W
    F = T - 2
    assert F >= 1

    # channels-last once (hoisted out of the per-frame loop).
    video_rows = jnp.transpose(video[2:], (0, 1, 3, 4, 2)).reshape(F * B * HW, C)
    # frame i (>=2) consumes context = history(control[i-1]) -> control frames 1..T-2
    ctrl_rows = jnp.transpose(control[1:T - 1], (0, 1, 3, 4, 2)).reshape(F * B * HW, C)

    # all frames' noise in one draw
    noise_rows = jax.random.normal(noise_key, (F * B * HW, C), jnp.float32)

    # per-(frame,batch) q_sample coefficients; grid step g = f*B + b -> coef[b]
    sa_g = jnp.tile(sqrt_alphas_cumprod[t], F)                    # (F*B,)
    soma_g = jnp.tile(sqrt_one_minus_alphas_cumprod[t], F)        # (F*B,)

    # per-batch time-conditioning bias of the synthetic denoise_fn (tiny glue)
    tb = time_embedding(t, T_DIM) @ params["wt"]                  # (B, HIDDEN)
    tb_g = jnp.tile(tb, (F, 1))                                   # (F*B, HIDDEN)

    # split w1 so the kernel avoids materializing a concat (review item)
    w1x = params["w1"][:C]        # (C, HIDDEN)
    w1c = params["w1"][C:]        # (CCTX, HIDDEN)

    total_abs = fused_diffusion_loss(
        video_rows, noise_rows, ctrl_rows, sa_g, soma_g, tb_g,
        params["wh"], params["bh"], w1x, w1c, params["w2"], hw=HW)

    # sum_f mean_f(|.|) / F  ==  total_abs / (B*HW*C) / F   (equal frame sizes)
    return total_abs / jnp.float32(B * HW * C) / jnp.float32(F)


# ----------------------------------------------------------------------------
if __name__ == "__main__":
    key = jax.random.PRNGKey(0)
    k_batch, k_t, k_params, k_noise = jax.random.split(key, 4)

    T, B, H, W = 4, 2, 16, 16
    buffers = make_buffers(timesteps=1000)

    batch = jax.random.normal(k_batch, (T, B, 6, H, W), jnp.float32)
    t = jax.random.randint(k_t, (B,), 0, buffers["num_timesteps"])
    params = init_params(k_params)

    fwd = jax.jit(gaussian_diffusion_forward)
    loss = fwd(batch, t, params,
               buffers["sqrt_alphas_cumprod"],
               buffers["sqrt_one_minus_alphas_cumprod"],
               k_noise)
    loss = jax.block_until_ready(loss)
    assert loss.shape == () and bool(jnp.isfinite(loss))
    print("KERNEL_OK")
</pallas_src>

<mosaic_0001>
module attributes {stable_mosaic.version = 11 : i64} {
  func.func @fused_kernel(%arg0: i32, %arg1: i32, %arg2: memref<4xf32, #tpu.memory_space<smem>>, %arg3: memref<4xf32, #tpu.memory_space<smem>>, %arg4: memref<256x3xf32, #tpu.memory_space<vmem>>, %arg5: memref<256x3xf32, #tpu.memory_space<vmem>>, %arg6: memref<256x3xf32, #tpu.memory_space<vmem>>, %arg7: memref<4x32xf32, #tpu.memory_space<vmem>>, %arg8: memref<3x13xf32, #tpu.memory_space<vmem>>, %arg9: memref<1x13xf32, #tpu.memory_space<vmem>>, %arg10: memref<3x32xf32, #tpu.memory_space<vmem>>, %arg11: memref<13x32xf32, #tpu.memory_space<vmem>>, %arg12: memref<32x3xf32, #tpu.memory_space<vmem>>, %arg13: memref<1x1xf32, #tpu.memory_space<smem>>) attributes {dimension_semantics = [#tpu.dimension_semantics<arbitrary>, #tpu.dimension_semantics<arbitrary>], iteration_bounds = array<i64: 4, 1>, scalar_prefetch = 0 : i64, scratch_operands = 0 : i64, tpu.core_type = #tpu.core_type<tc>, window_params = [{transform_indices = @transform_0, window_bounds = array<i64: 4>}, {transform_indices = @transform_1, window_bounds = array<i64: 4>}, {transform_indices = @transform_2, window_bounds = array<i64: 256, 3>}, {transform_indices = @transform_3, window_bounds = array<i64: 256, 3>}, {transform_indices = @transform_4, window_bounds = array<i64: 256, 3>}, {pipeline_mode = #tpu.pipeline_mode<synchronous>, transform_indices = @transform_5, window_bounds = array<i64: 4, 32>}, {pipeline_mode = #tpu.pipeline_mode<synchronous>, transform_indices = @transform_6, window_bounds = array<i64: 3, 13>}, {pipeline_mode = #tpu.pipeline_mode<synchronous>, transform_indices = @transform_7, window_bounds = array<i64: 1, 13>}, {pipeline_mode = #tpu.pipeline_mode<synchronous>, transform_indices = @transform_8, window_bounds = array<i64: 3, 32>}, {pipeline_mode = #tpu.pipeline_mode<synchronous>, transform_indices = @transform_9, window_bounds = array<i64: 13, 32>}, {pipeline_mode = #tpu.pipeline_mode<synchronous>, transform_indices = @transform_10, window_bounds = array<i64: 32, 3>}, {transform_indices = @transform_11, window_bounds = array<i64: 1, 1>}]} {
    %c0_i32 = arith.constant 0 : i32
    %0 = arith.cmpi eq, %arg0, %c0_i32 : i32
    %c0_i32_0 = arith.constant 0 : i32
    %1 = arith.cmpi eq, %arg1, %c0_i32_0 : i32
    %2 = arith.andi %0, %1 : i1
    %3 = arith.extui %2 : i1 to i32
    %c0_i32_1 = arith.constant 0 : i32
    %4 = arith.cmpi ne, %3, %c0_i32_1 : i32
    scf.if %4 {
      %cst_30 = arith.constant 0.000000e+00 : f32
      %c0_31 = arith.constant 0 : index
      %c0_32 = arith.constant 0 : index
      %56 = memref.load %arg13[%c0_31, %c0_32] : memref<1x1xf32, #tpu.memory_space<smem>>
      memref.store %cst_30, %arg13[%c0_31, %c0_32] : memref<1x1xf32, #tpu.memory_space<smem>>
    } else {
    }
    %c0 = arith.constant 0 : index
    %c0_2 = arith.constant 0 : index
    %5 = vector.load %arg6[%c0, %c0_2] : memref<256x3xf32, #tpu.memory_space<vmem>>, vector<256x3xf32>
    %c0_3 = arith.constant 0 : index
    %c0_4 = arith.constant 0 : index
    %6 = vector.load %arg8[%c0_3, %c0_4] : memref<3x13xf32, #tpu.memory_space<vmem>>, vector<3x13xf32>
    %cst = arith.constant dense<0.000000e+00> : vector<256x13xf32>
    %7 = tpu.matmul %5, %6, %cst {dimension_numbers = #tpu.dot_dimension_numbers<[1], [0], [0], [1], [0, 0, 1, 1], [], []>} : vector<256x3xf32>, vector<3x13xf32>, vector<256x13xf32> -> vector<256x13xf32>
    %c0_5 = arith.constant 0 : index
    %c0_6 = arith.constant 0 : index
    %8 = vector.load %arg9[%c0_5, %c0_6] : memref<1x13xf32, #tpu.memory_space<vmem>>, vector<1x13xf32>
    %9 = vector.broadcast %8 : vector<1x13xf32> to vector<256x13xf32>
    %10 = arith.addf %7, %9 : vector<256x13xf32>
    %11 = math.tanh %10 : vector<256x13xf32>
    %c0_7 = arith.constant 0 : index
    %c0_8 = arith.constant 0 : index
    %12 = vector.load %arg5[%c0_7, %c0_8] : memref<256x3xf32, #tpu.memory_space<vmem>>, vector<256x3xf32>
    %13 = arith.index_cast %arg0 : i32 to index
    %14 = memref.load %arg2[%13] : memref<4xf32, #tpu.memory_space<smem>>
    %c0_9 = arith.constant 0 : index
    %c0_10 = arith.constant 0 : index
    %15 = vector.load %arg4[%c0_9, %c0_10] : memref<256x3xf32, #tpu.memory_space<vmem>>, vector<256x3xf32>
    %16 = vector.broadcast %14 : f32 to vector<256x3xf32>
    %17 = arith.mulf %16, %15 : vector<256x3xf32>
    %18 = arith.index_cast %arg0 : i32 to index
    %19 = memref.load %arg3[%18] : memref<4xf32, #tpu.memory_space<smem>>
    %20 = vector.broadcast %19 : f32 to vector<256x3xf32>
    %21 = arith.mulf %20, %12 : vector<256x3xf32>
    %22 = arith.addf %17, %21 : vector<256x3xf32>
    %23 = arith.index_cast %arg0 : i32 to index
    %c0_11 = arith.constant 0 : index
    %24 = vector.load %arg7[%23, %c0_11] : memref<4x32xf32, #tpu.memory_space<vmem>>, vector<1x32xf32>
    %c0_12 = arith.constant 0 : index
    %c0_13 = arith.constant 0 : index
    %25 = vector.load %arg10[%c0_12, %c0_13] : memref<3x32xf32, #tpu.memory_space<vmem>>, vector<3x32xf32>
    %cst_14 = arith.constant dense<0.000000e+00> : vector<256x32xf32>
    %26 = tpu.matmul %22, %25, %cst_14 {dimension_numbers = #tpu.dot_dimension_numbers<[1], [0], [0], [1], [0, 0, 1, 1], [], []>} : vector<256x3xf32>, vector<3x32xf32>, vector<256x32xf32> -> vector<256x32xf32>
    %c0_15 = arith.constant 0 : index
    %c0_16 = arith.constant 0 : index
    %27 = vector.load %arg11[%c0_15, %c0_16] : memref<13x32xf32, #tpu.memory_space<vmem>>, vector<13x32xf32>
    %cst_17 = arith.constant dense<0.000000e+00> : vector<256x32xf32>
    %28 = tpu.matmul %11, %27, %cst_17 {dimension_numbers = #tpu.dot_dimension_numbers<[1], [0], [0], [1], [0, 0, 1, 1], [], []>} : vector<256x13xf32>, vector<13x32xf32>, vector<256x32xf32> -> vector<256x32xf32>
    %29 = arith.addf %26, %28 : vector<256x32xf32>
    %30 = vector.broadcast %24 : vector<1x32xf32> to vector<256x32xf32>
    %31 = arith.addf %29, %30 : vector<256x32xf32>
    %32 = arith.mulf %31, %31 : vector<256x32xf32>
    %33 = arith.mulf %31, %32 : vector<256x32xf32>
    %cst_18 = arith.constant 4.471500e-02 : f32
    %34 = vector.broadcast %cst_18 : f32 to vector<256x32xf32>
    %35 = arith.mulf %34, %33 : vector<256x32xf32>
    %36 = arith.addf %31, %35 : vector<256x32xf32>
    %cst_19 = arith.constant 0.797884583 : f32
    %37 = vector.broadcast %cst_19 : f32 to vector<256x32xf32>
    %38 = arith.mulf %37, %36 : vector<256x32xf32>
    %39 = math.tanh %38 : vector<256x32xf32>
    %cst_20 = arith.constant 1.000000e+00 : f32
    %40 = vector.broadcast %cst_20 : f32 to vector<256x32xf32>
    %41 = arith.addf %40, %39 : vector<256x32xf32>
    %cst_21 = arith.constant 5.000000e-01 : f32
    %42 = vector.broadcast %cst_21 : f32 to vector<256x32xf32>
    %43 = arith.mulf %42, %41 : vector<256x32xf32>
    %44 = arith.mulf %31, %43 : vector<256x32xf32>
    %c0_22 = arith.constant 0 : index
    %c0_23 = arith.constant 0 : index
    %45 = vector.load %arg12[%c0_22, %c0_23] : memref<32x3xf32, #tpu.memory_space<vmem>>, vector<32x3xf32>
    %cst_24 = arith.constant dense<0.000000e+00> : vector<256x3xf32>
    %46 = tpu.matmul %44, %45, %cst_24 {dimension_numbers = #tpu.dot_dimension_numbers<[1], [0], [0], [1], [0, 0, 1, 1], [], []>} : vector<256x32xf32>, vector<32x3xf32>, vector<256x3xf32> -> vector<256x3xf32>
    %c0_25 = arith.constant 0 : index
    %c0_26 = arith.constant 0 : index
    %47 = memref.load %arg13[%c0_25, %c0_26] : memref<1x1xf32, #tpu.memory_space<smem>>
    %48 = arith.subf %12, %46 : vector<256x3xf32>
    %49 = math.absf %48 : vector<256x3xf32>
    %50 = vector.shape_cast %49 : vector<256x3xf32> to vector<1x256x3xf32>
    %cst_27 = arith.constant dense<0.000000e+00> : vector<1xf32>
    %51 = vector.multi_reduction <add>, %50, %cst_27 [1, 2] : vector<1x256x3xf32> to vector<1xf32>
    %52 = vector.shape_cast %51 : vector<1xf32> to vector<1x1x1xf32>
    %53 = vector.extract %52[0, 0, 0] : f32 from vector<1x1x1xf32>
    %54 = arith.addf %47, %53 : f32
    %c0_28 = arith.constant 0 : index
    %c0_29 = arith.constant 0 : index
    %55 = memref.load %arg13[%c0_28, %c0_29] : memref<1x1xf32, #tpu.memory_space<smem>>
    memref.store %54, %arg13[%c0_28, %c0_29] : memref<1x1xf32, #tpu.memory_space<smem>>
    return
  }
  func.func @transform_0(%arg0: i32, %arg1: i32) -> i32 {
    %c0_i32 = arith.constant 0 : i32
    %c0_i32_0 = arith.constant 0 : i32
    return %c0_i32 : i32
  }
  func.func @transform_1(%arg0: i32, %arg1: i32) -> i32 {
    %c0_i32 = arith.constant 0 : i32
    %c0_i32_0 = arith.constant 0 : i32
    return %c0_i32 : i32
  }
  func.func @transform_2(%arg0: i32, %arg1: i32) -> (i32, i32) {
    %c1_i32 = arith.constant 1 : i32
    %0 = arith.muli %arg0, %c1_i32 : i32
    %1 = arith.addi %0, %arg1 : i32
    %c0_i32 = arith.constant 0 : i32
    %c0_i32_0 = arith.constant 0 : i32
    return %1, %c0_i32 : i32, i32
  }
  func.func @transform_3(%arg0: i32, %arg1: i32) -> (i32, i32) {
    %c1_i32 = arith.constant 1 : i32
    %0 = arith.muli %arg0, %c1_i32 : i32
    %1 = arith.addi %0, %arg1 : i32
    %c0_i32 = arith.constant 0 : i32
    %c0_i32_0 = arith.constant 0 : i32
    return %1, %c0_i32 : i32, i32
  }
  func.func @transform_4(%arg0: i32, %arg1: i32) -> (i32, i32) {
    %c1_i32 = arith.constant 1 : i32
    %0 = arith.muli %arg0, %c1_i32 : i32
    %1 = arith.addi %0, %arg1 : i32
    %c0_i32 = arith.constant 0 : i32
    %c0_i32_0 = arith.constant 0 : i32
    return %1, %c0_i32 : i32, i32
  }
  func.func @transform_5(%arg0: i32, %arg1: i32) -> (i32, i32) {
    %c0_i32 = arith.constant 0 : i32
    %c0_i32_0 = arith.constant 0 : i32
    %c0_i32_1 = arith.constant 0 : i32
    return %c0_i32, %c0_i32_0 : i32, i32
  }
  func.func @transform_6(%arg0: i32, %arg1: i32) -> (i32, i32) {
    %c0_i32 = arith.constant 0 : i32
    %c0_i32_0 = arith.constant 0 : i32
    %c0_i32_1 = arith.constant 0 : i32
    return %c0_i32, %c0_i32_0 : i32, i32
  }
  func.func @transform_7(%arg0: i32, %arg1: i32) -> (i32, i32) {
    %c0_i32 = arith.constant 0 : i32
    %c0_i32_0 = arith.constant 0 : i32
    %c0_i32_1 = arith.constant 0 : i32
    return %c0_i32, %c0_i32_0 : i32, i32
  }
  func.func @transform_8(%arg0: i32, %arg1: i32) -> (i32, i32) {
    %c0_i32 = arith.constant 0 : i32
    %c0_i32_0 = arith.constant 0 : i32
    %c0_i32_1 = arith.constant 0 : i32
    return %c0_i32, %c0_i32_0 : i32, i32
  }
  func.func @transform_9(%arg0: i32, %arg1: i32) -> (i32, i32) {
    %c0_i32 = arith.constant 0 : i32
    %c0_i32_0 = arith.constant 0 : i32
    %c0_i32_1 = arith.constant 0 : i32
    return %c0_i32, %c0_i32_0 : i32, i32
  }
  func.func @transform_10(%arg0: i32, %arg1: i32) -> (i32, i32) {
    %c0_i32 = arith.constant 0 : i32
    %c0_i32_0 = arith.constant 0 : i32
    %c0_i32_1 = arith.constant 0 : i32
    return %c0_i32, %c0_i32_0 : i32, i32
  }
  func.func @transform_11(%arg0: i32, %arg1: i32) -> (i32, i32) {
    %c0_i32 = arith.constant 0 : i32
    %c0_i32_0 = arith.constant 0 : i32
    %c0_i32_1 = arith.constant 0 : i32
    return %c0_i32, %c0_i32_0 : i32, i32
  }
}

</mosaic_0001>

<bundles_post_ra>
// kernel: tile.18
= control target key start
LH: loop header
LB: loop body
LE: loop exit
PB: predicated region body
PF: predicated region fallthrough
CT: control target
= control target key end

     0   :  { %s22_s0 = inlined_call_operand.vmem [shape: f32[2], index: 0, kind: input, shape index: {}]   ;;  %s23_s1 = inlined_call_operand.vmem [shape: f32[2,2], index: 1, kind: output, shape index: {}]  }
   0x1   :  { %v4_v0 = vld [vmem:[%s22_s0] ss:$0 sm:$0xff] }
   0x2   :  { %5 = vst [vmem:[%s23_s1] sm:$0x3] %v4_v0 }

// kernel: tile.19
= control target key start
LH: loop header
LB: loop body
LE: loop exit
PB: predicated region body
PF: predicated region fallthrough
CT: control target
= control target key end

     0   :  { %vm7_vm0 = vcmask 15360   ;;  %vm13_vm1 = vcmask 31760   ;;  %s39_s0 = inlined_call_operand.vmem [shape: f32[2,2], index: 0, kind: input, shape index: {}]   ;;  %s40_s1 = inlined_call_operand.vmem [shape: f32[4], index: 1, kind: output, shape index: {}]  }
   0x1   :  { %v4_v0 = vld [vmem:[%s39_s0] sm:$0x3]  ;;  %s22_s0 = smov 2  }
   0x2   :  { %5 = vst [vmem:[#allocation1] sm:$0x3] %v4_v0 }
   0x9   :  { %v10_v1 = vld [vmem:[#allocation1 + $0x1] sm:$0x1]   ;;  %v6_v2 = vld [vmem:[#allocation1] sm:$0x1]  }
   0xa   :  { %11 = vrot.lane.b32.xlu0 %v10_v1, %s22_s0  ;;  %8 = vst.msk [vmem:[#allocation0] sm:$0x1] %vm7_vm0, %v6_v2  }
  0x7c   :  { %v12_v3 = vpop.permute.xlu0 %11  }
  0x7d   :  { %14 = vst.msk [vmem:[#allocation0] sm:$0x1] %vm13_vm1, %v12_v3  }
  0x84   :  { %v17_v4 = vld [vmem:[#allocation0] sm:$0x1] }
  0x85   :  { %20 = vst [vmem:[%s40_s1] sm:$0x1] %v17_v4 }

// kernel: gaussian_diffusion_forward.1
= control target key start
LH: loop header
LB: loop body
LE: loop exit
PB: predicated region body
PF: predicated region fallthrough
CT: control target
= control target key end

     0   :  { %16 = vsyncpa [#allocation4], 0  ;;  %s3333_s0 = inlined_call_operand.vmem [shape: f32[4], index: 0, kind: input, shape index: {}]   ;;  %s3334_s1 = inlined_call_operand.vmem [shape: f32[4], index: 1, kind: input, shape index: {}]   ;;  %s3335_s2 = inlined_call_operand.vmem [shape: f32[1024,3], index: 2, kind: input, shape index: {}]   ;;  %s3336_s3 = inlined_call_operand.vmem [shape: f32[1024,3], index: 3, kind: input, shape index: {}]   ;;  %s3337_s4 = inlined_call_operand.vmem [shape: f32[1024,3], index: 4, kind: input, shape index: {}]   ;;  %s3338_s5 = inlined_call_operand.vmem [shape: f32[4,32], index: 5, kind: input, shape index: {}]   ;;  %s3339_s6 = inlined_call_operand.vmem [shape: f32[3,13], index: 6, kind: input, shape index: {}]   ;;  %s3340_s7 = inlined_call_operand.vmem [shape: f32[1,13], index: 7, kind: input, shape index: {}]   ;;  %s3341_s8 = inlined_call_operand.vmem [shape: f32[3,32], index: 8, kind: input, shape index: {}]   ;;  %s3342_s9 = inlined_call_operand.vmem [shape: f32[13,32], index: 9, kind: input, shape index: {}]   ;;  %s3343_s10 = inlined_call_operand.vmem [shape: f32[32,3], index: 10, kind: input, shape index: {}]   ;;  %s3344_s11 = inlined_call_operand.hbm [shape: f32[1,1], index: 11, kind: output, shape index: {}]  }
   0x1   :  { %17 = vsyncpa [#allocation6], 0 }
   0x2   :  { %18 = vsyncpa [#allocation3], 0  ;;  %s2658_s17 = smov 0   ;;  %s2660_s18 = smov 0  }
   0x3   :  { %s2662_s19 = smov 0  }
   0x4 LB: > { %s2143_s20 = sadd.s32 4294967295, %s2592_s19   ;;  %s36_s21 = sadd.s32 1, %s2588_s18  ;;  %s2592_s19 = sphi %s2662_s19, %s24_s19   ;;  %s2588_s18 = sphi %s2660_s18, %s3347_s18   ;;  %s2584_s17 = sphi %s2658_s17, %s3346_s17  }
   0x5   : > { %p38_p0 = scmp.ge.s32.totalorder %s36_s21, 4  ;;  %p2144_p1 = scmp.ge.s32.totalorder %s2592_s19, 1 }
   0x6   : > { %p314_p2 = scmp.lt.s32.totalorder %s2592_s19, 5  ;;  %p2681_p4 = scmp.eq.s32.totalorder %s2143_s20, 0 }
   0x7   : > { %s3349_s21 = smov (%p38_p0, %s36_s21), 0  ;;  %s326_s25 = sshll.u32 %s3333_s0, 4  ;;  %s327_s25 = int_to_ptr.vmem [resolvable:$true] %s326_s25 }
   0x8   : > { %p315_p3 = pnand %p2144_p1, %p314_p2  ;;  %s336_s28 = sshll.u32 %s3334_s1, 4  ;;  %s337_s28 = int_to_ptr.vmem [resolvable:$true] %s336_s28 }
   0x9   : > { %s2594_s29 = smov [#allocation2]   ;;  %s2595_s30 = smov [#allocation5]  }
   0xa   : > { %p2309_p5 = pneg %p315_p3 }
   0xb   : > { %400 = sbr.rel (%p315_p3) target bundleno = 888 (0x378), region = 64 }
   0xc   : > { %p2310_p6 = pnand %p2681_p4, %p2309_p5 }
   0xe   : > { %2312 = dma.vmem_to_smem (!%p2310_p6), %s327_s25, 16, %s2594_s29, [#allocation4]  }
   0xf   : > { %2315 = dma.vmem_to_smem (!%p2310_p6), %s337_s28, 16, %s2595_s30, [#allocation6]  }
  0x10   : > { %2571 = dma.done.wait (%p2681_p4), [#allocation4], 16  }
  0x11   : > { %2573 = vsyncadd (%p2681_p4), [#allocation4], 4294967280 }
  0x12   : > { %2575 = dma.done.wait (%p2681_p4), [#allocation6], 16  }
  0x13   : > { %2577 = vsyncadd (%p2681_p4), [#allocation6], 4294967280 }
  0x14   : > { %412 = sfence }
  0x15   : > { %v519_v0 = vld [vmem:[%s3339_s6] sm:$0x7]  ;;  %vm621_vm0 = vcmask 1042432   ;;  %s2151_s14 = sshll.u32 %s2584_s17, 5  ;;  %vm524_vm1 = vcmask 23552   ;;  %s802_s24 = sld [smem:[#allocation2 + %s2584_s17]] }
  0x16   : > { %2158 = vmatpush.msk.msra.mxu0 %vm621_vm0, %v519_v0  ;;  %p457_p7 = scmp.lt.s32.totalorder %s2151_s14, 127  ;;  %s868_s25 = sld [smem:[#allocation5 + %s2584_s17]]  ;;  %v936_v20 = vld [vmem:[%s3341_s8] sm:$0x7]  ;;  %v938_v22 = vld [vmem:[%s3342_s9 + $0x8] sm:$0x1f] }
  0x17   : > { %2224 = vmatpush.msk.msra.mxu2 %vm621_vm0, %v936_v20  ;;  %vm1036_vm2 = vcmask 1044480   ;;  %v937_v26 = vld [vmem:[%s3342_s9] sm:$0xff]  ;;  %vm939_vm3 = vcmask 105472   ;;  %s2813_s30 = scalar_lea.vmem %s3338_s5, %s2584_s17  ;;  %vm1690_vm4 = vcmask 261120   ;;  %p479_p8 = scmp.eq.s32.totalorder %s2584_s17, 0 }
  0x18   : > { %s3351_s14 = smov (!%p457_p7, %s2151_s14), 127  ;;  %2191 = vmatpush.msk.msra.mxu1 %vm1036_vm2, %v938_v22  ;;  %v2797_v42 = vld [vmem:[%s3340_s7] ss:$0 sm:$0xff]  ;;  %s2596_s27 = smov 0.0  }
  0x19   : > { %s2706_s15 = sshll.u32 %s3351_s14, 3  ;;  %2304 = sst [smem:[#allocation7]] (%p479_p8), %s2596_s27 }
  0x1a   : > { %s2712_s22 = scalar_lea.vmem %s3337_s4, %s2706_s15  ;;  %s2744_s28 = scalar_lea.vmem %s3335_s2, %s2706_s15  ;;  %1055 = vmatpush.msra.mxu1 %v937_v26 }
  0x1b   : > { %v487_v1 = vld [vmem:[%s2712_s22] sm:$0xff]  ;;  %v488_v2 = vld [vmem:[%s2712_s22 + $0x8] sm:$0xff]  ;;  %v489_v3 = vld [vmem:[%s2712_s22 + $0x10] sm:$0xff]  ;;  %s2750_s12 = scalar_lea.vmem %s3336_s3, %s2706_s15  ;;  %v2754_v15 = vstv %s802_s24  ;;  %s2046_s13 = sshll.u32 %s3344_s11, 4  ;;  %s2047_s13 = int_to_ptr.hbm [resolvable:$true] %s2046_s13 }
  0x1c   : > { %2159 = vmatmul.msk.f32.vlgmr.msra.gmra.mxu0 %vm524_vm1, %v487_v1  ;;  %v490_v4 = vld [vmem:[%s2712_s22 + $0x18] sm:$0xff]  ;;  %v491_v5 = vld [vmem:[%s2712_s22 + $0x20] sm:$0xff]  ;;  %v492_v6 = vld [vmem:[%s2712_s22 + $0x28] sm:$0xff]  ;;  %v2756_v16 = vstv %s868_s25  ;;  %p2320_p9 = scmp.eq.s32.totalorder %s2143_s20, 3 }
  0x1d   : > { %v493_v7 = vld [vmem:[%s2712_s22 + $0x30] sm:$0xff]  ;;  %v494_v8 = vld [vmem:[%s2712_s22 + $0x38] sm:$0xff]  ;;  %v495_v9 = vld [vmem:[%s2712_s22 + $0x40] sm:$0xff] }
  0x1e   : > { %v496_v10 = vld [vmem:[%s2712_s22 + $0x48] sm:$0xff]  ;;  %v497_v11 = vld [vmem:[%s2712_s22 + $0x50] sm:$0xff]  ;;  %v498_v12 = vld [vmem:[%s2712_s22 + $0x58] sm:$0xff] }
  0x1f   : > { %v770_v13 = vld [vmem:[%s2750_s12] sm:$0xff]  ;;  %v771_v23 = vld [vmem:[%s2750_s12 + $0x8] sm:$0xff]  ;;  %v772_v30 = vld [vmem:[%s2750_s12 + $0x10] sm:$0xff] }
  0x20   : > { %v803_v14 = vld [vmem:[%s2744_s28] sm:$0xff]  ;;  %v870_v19 = vmul.f32 %v2756_v16, %v770_v13  ;;  %v804_v24 = vld [vmem:[%s2744_s28 + $0x8] sm:$0xff]  ;;  %v871_v28 = vmul.f32 %v2756_v16, %v771_v23  ;;  %v805_v31 = vld [vmem:[%s2744_s28 + $0x10] sm:$0xff]  ;;  %v872_v34 = vmul.f32 %v2756_v16, %v772_v30 }
  0x21   : > { %v499_v17 = vld [vmem:[%s2712_s22 + $0x60] sm:$0xff]  ;;  %v836_v18 = vmul.f32 %v2754_v15, %v803_v14  ;;  %v500_v25 = vld [vmem:[%s2712_s22 + $0x68] sm:$0xff]  ;;  %v837_v27 = vmul.f32 %v2754_v15, %v804_v24  ;;  %v501_v32 = vld [vmem:[%s2712_s22 + $0x70] sm:$0xff]  ;;  %v838_v33 = vmul.f32 %v2754_v15, %v805_v31 }
  0x22   : > { %v773_v36 = vld [vmem:[%s2750_s12 + $0x18] sm:$0xff]  ;;  %v774_v43 = vld [vmem:[%s2750_s12 + $0x20] sm:$0xff]  ;;  %v775_v51 = vld [vmem:[%s2750_s12 + $0x28] sm:$0xff] }
  0x23   : > { %v902_v21 = vadd.f32 %v870_v19, %v836_v18  ;;  %v903_v29 = vadd.f32 %v871_v28, %v837_v27  ;;  %v904_v35 = vadd.f32 %v872_v34, %v838_v33  ;;  %v806_v37 = vld [vmem:[%s2744_s28 + $0x18] sm:$0xff]  ;;  %v873_v40 = vmul.f32 %v2756_v16, %v773_v36  ;;  %v807_v44 = vld [vmem:[%s2744_s28 + $0x20] sm:$0xff]  ;;  %v808_v52 = vld [vmem:[%s2744_s28 + $0x28] sm:$0xff] }
  0x24   : > { %2160 = vmatmul.msk.f32.gmra.mxu0 %vm524_vm1, %v488_v2  ;;  %v502_v38 = vld [vmem:[%s2712_s22 + $0x78] sm:$0xff]  ;;  %v839_v39 = vmul.f32 %v2754_v15, %v806_v37  ;;  %v503_v46 = vld [vmem:[%s2712_s22 + $0x80] sm:$0xff]  ;;  %v840_v47 = vmul.f32 %v2754_v15, %v807_v44  ;;  %v874_v48 = vmul.f32 %v2756_v16, %v774_v43  ;;  %v504_v54 = vld [vmem:[%s2712_s22 + $0x88] sm:$0xff]  ;;  %v841_v55 = vmul.f32 %v2754_v15, %v808_v52 }
  0x25   : > { %2225 = vmatmul.msk.f32.vlgmr.msra.gmra.mxu2 %vm524_vm1, %v902_v21  ;;  %v875_v56 = vmul.f32 %v2756_v16, %v775_v51  ;;  %v776_v60 = vld [vmem:[%s2750_s12 + $0x30] sm:$0xff]  ;;  %v778_v14 = vld [vmem:[%s2750_s12 + $0x40] sm:$0xff]  ;;  %v812_v26 = vld [vmem:[%s2744_s28 + $0x48] sm:$0xff] }
  0x26   : > { %v905_v41 = vadd.f32 %v873_v40, %v839_v39  ;;  %v906_v50 = vadd.f32 %v874_v48, %v840_v47  ;;  %v809_v61 = vld [vmem:[%s2744_s28 + $0x30] sm:$0xff]  ;;  %v876_v1 = vmul.f32 %v2756_v16, %v776_v60  ;;  %v507_v19 = vld [vmem:[%s2712_s22 + $0xa0] sm:$0xff]  ;;  %v878_v21 = vmul.f32 %v2756_v16, %v778_v14  ;;  %v508_v28 = vld [vmem:[%s2712_s22 + $0xa8] sm:$0xff] }
  0x27   : > { %v907_v59 = vadd.f32 %v875_v56, %v841_v55  ;;  %v505_v63 = vld [vmem:[%s2712_s22 + $0x90] sm:$0xff]  ;;  %v842_v0 = vmul.f32 %v2754_v15, %v809_v61  ;;  %v781_v44 = vld [vmem:[%s2750_s12 + $0x58] sm:$0xff]  ;;  %v511_v56 = vld [vmem:[%s2712_s22 + $0xc0] sm:$0xff] }
  0x28   : > { %v780_v34 = vld [vmem:[%s2750_s12 + $0x50] sm:$0xff]  ;;  %v510_v47 = vld [vmem:[%s2712_s22 + $0xb8] sm:$0xff] }
  0x29   : > { %v509_v37 = vld [vmem:[%s2712_s22 + $0xb0] sm:$0xff]  ;;  %v880_v39 = vmul.f32 %v2756_v16, %v780_v34 }
  0x2c   : > { %2161 = vmatmul.msk.f32.gmra.mxu0 %vm524_vm1, %v489_v3 }
  0x2d   : > { %2226 = vmatmul.msk.f32.gmra.mxu2 %vm524_vm1, %v903_v29  ;;  %v845_v29 = vmul.f32 %v2754_v15, %v812_v26 }
  0x34   : > { %2162 = vmatmul.msk.f32.gmra.mxu0 %vm524_vm1, %v490_v4  ;;  %v908_v4 = vadd.f32 %v876_v1, %v842_v0  ;;  %v512_v1 = vld [vmem:[%s2712_s22 + $0xc8] sm:$0xff] }
  0x35   : > { %2227 = vmatmul.msk.f32.gmra.mxu2 %vm524_vm1, %v904_v35  ;;  %v813_v35 = vld [vmem:[%s2744_s28 + $0x50] sm:$0xff] }
  0x3c   : > { %2163 = vmatmul.msk.f32.gmra.mxu0 %vm524_vm1, %v491_v5  ;;  %v777_v5 = vld [vmem:[%s2750_s12 + $0x38] sm:$0xff] }
  0x3d   : > { %2228 = vmatmul.msk.f32.gmra.mxu2 %vm524_vm1, %v905_v41 }
  0x44   : > { %2164 = vmatmul.msk.f32.gmra.mxu0 %vm524_vm1, %v492_v6  ;;  %v810_v6 = vld [vmem:[%s2744_s28 + $0x38] sm:$0xff] }
  0x45   : > { %2229 = vmatmul.msk.f32.gmra.mxu2 %vm524_vm1, %v906_v50 }
  0x4c   : > { %2165 = vmatmul.msk.f32.gmra.mxu0 %vm524_vm1, %v493_v7 }
  0x4d   : > { %2230 = vmatmul.msk.f32.gmra.mxu2 %vm524_vm1, %v907_v59 }
  0x54   : > { %2166 = vmatmul.msk.f32.gmra.mxu0 %vm524_vm1, %v494_v8  ;;  %v506_v8 = vld [vmem:[%s2712_s22 + $0x98] sm:$0xff] }
  0x55   : > { %2231 = vmatmul.msk.f32.gmra.mxu2 %vm524_vm1, %v908_v4 }
  0x5c   : > { %2167 = vmatmul.msk.f32.gmra.mxu0 %vm524_vm1, %v495_v9  ;;  %v843_v9 = vmul.f32 %v2754_v15, %v810_v6 }
  0x64   : > { %2168 = vmatmul.msk.f32.gmra.mxu0 %vm524_vm1, %v496_v10  ;;  %v877_v10 = vmul.f32 %v2756_v16, %v777_v5 }
  0x66   : > { %v909_v13 = vadd.f32 %v877_v10, %v843_v9  ;;  %v513_v10 = vld [vmem:[%s2712_s22 + $0xd0] sm:$0xff] }
  0x68   : > { %2232 = vmatmul.msk.f32.gmra.mxu2 %vm524_vm1, %v909_v13 }
  0x6c   : > { %2169 = vmatmul.msk.f32.gmra.mxu0 %vm524_vm1, %v497_v11 }
  0x74   : > { %2170 = vmatmul.msk.f32.gmra.mxu0 %vm524_vm1, %v498_v12 }
  0x7c   : > { %2171 = vmatmul.msk.f32.gmra.mxu0 %vm524_vm1, %v499_v17  ;;  %v811_v17 = vld [vmem:[%s2744_s28 + $0x40] sm:$0xff] }
  0x7d   : > { %v844_v20 = vmul.f32 %v2754_v15, %v811_v17 }
  0x7f   : > { %v910_v24 = vadd.f32 %v878_v21, %v844_v20  ;;  %v514_v21 = vld [vmem:[%s2712_s22 + $0xd8] sm:$0xff] }
  0x81   : > { %2233 = vmatmul.msk.f32.gmra.mxu2 %vm524_vm1, %v910_v24 }
  0x84   : > { %2172 = vmatmul.msk.f32.gmra.mxu0 %vm524_vm1, %v500_v25  ;;  %v779_v25 = vld [vmem:[%s2750_s12 + $0x48] sm:$0xff] }
  0x85   : > { %v879_v30 = vmul.f32 %v2756_v16, %v779_v25 }
  0x87   : > { %v911_v33 = vadd.f32 %v879_v30, %v845_v29  ;;  %v515_v30 = vld [vmem:[%s2712_s22 + $0xe0] sm:$0xff] }
  0x89   : > { %2234 = vmatmul.msk.f32.gmra.mxu2 %vm524_vm1, %v911_v33 }
  0x8c   : > { %2173 = vmatmul.msk.f32.gmra.mxu0 %vm524_vm1, %v501_v32 }
  0x94   : > { %2174 = vmatmul.msk.f32.gmra.mxu0 %vm524_vm1, %v502_v38  ;;  %v846_v38 = vmul.f32 %v2754_v15, %v813_v35 }
  0x96   : > { %v912_v43 = vadd.f32 %v880_v39, %v846_v38  ;;  %v820_v38 = vld [vmem:[%s2744_s28 + $0x88] sm:$0xff] }
  0x98   : > { %2235 = vmatmul.msk.f32.gmra.mxu2 %vm524_vm1, %v912_v43 }
  0x99   : > { %v642_v45 = vpop.f32.mrf.mxu0 }
  0x9a   : > { %v643_v49 = vadd.f32 %v2797_v42, %v642_v45  ;;  %v814_v45 = vld [vmem:[%s2744_s28 + $0x58] sm:$0xff] }
  0x9b   : > { %v847_v48 = vmul.f32 %v2754_v15, %v814_v45 }
  0x9c   : > { %2352 = vtanh.f32 %v643_v49  ;;  %2175 = vmatmul.msk.f32.gmra.mxu0 %vm524_vm1, %v503_v46  ;;  %v881_v49 = vmul.f32 %v2756_v16, %v781_v44 }
  0x9e   : > { %v913_v52 = vadd.f32 %v881_v49, %v847_v48  ;;  %v788_v48 = vld [vmem:[%s2750_s12 + $0x90] sm:$0xff] }
  0x9f   : > { %v821_v49 = vld [vmem:[%s2744_s28 + $0x90] sm:$0xff] }
  0xa0   : > { %2236 = vmatmul.msk.f32.gmra.mxu2 %vm524_vm1, %v913_v52  ;;  %v854_v52 = vmul.f32 %v2754_v15, %v821_v49 }
  0xa1   : > { %v645_v53 = vpop.f32.mrf.mxu0 }
  0xa2   : > { %v2353_v57 = vpop.eup %2352  ;;  %v646_v58 = vadd.f32 %v2797_v42, %v645_v53  ;;  %v782_v53 = vld [vmem:[%s2750_s12 + $0x60] sm:$0xff] }
  0xa3   : > { %2192 = vmatmul.msk.f32.vlgmr.msra.gmra.mxu1 %vm939_vm3, %v2353_v57 }
  0xa4   : > { %2354 = vtanh.f32 %v646_v58  ;;  %2176 = vmatmul.msk.f32.gmra.mxu0 %vm524_vm1, %v504_v54  ;;  %v815_v54 = vld [vmem:[%s2744_s28 + $0x60] sm:$0xff]  ;;  %v882_v58 = vmul.f32 %v2756_v16, %v782_v53  ;;  %v888_v53 = vmul.f32 %v2756_v16, %v788_v48 }
  0xa5   : > { %v848_v57 = vmul.f32 %v2754_v15, %v815_v54 }
  0xa7   : > { %v914_v61 = vadd.f32 %v882_v58, %v848_v57  ;;  %v789_v58 = vld [vmem:[%s2750_s12 + $0x98] sm:$0xff] }
  0xa9   : > { %v648_v62 = vpop.f32.mrf.mxu0  ;;  %2237 = vmatmul.msk.f32.gmra.mxu2 %vm524_vm1, %v914_v61  ;;  %v518_v61 = vld [vmem:[%s2712_s22 + $0xf8] sm:$0xff] }
  0xaa   : > { %v2355_v2 = vpop.eup %2354  ;;  %v649_v3 = vadd.f32 %v2797_v42, %v648_v62  ;;  %v783_v62 = vld [vmem:[%s2750_s12 + $0x68] sm:$0xff] }
  0xab   : > { %2193 = vmatmul.msk.f32.gmra.mxu1 %vm939_vm3, %v2355_v2 }
  0xac   : > { %2356 = vtanh.f32 %v649_v3  ;;  %2177 = vmatmul.msk.f32.gmra.mxu0 %vm524_vm1, %v505_v63  ;;  %v816_v63 = vld [vmem:[%s2744_s28 + $0x68] sm:$0xff]  ;;  %v883_v3 = vmul.f32 %v2756_v16, %v783_v62 }
  0xad   : > { %v849_v2 = vmul.f32 %v2754_v15, %v816_v63  ;;  %v889_v63 = vmul.f32 %v2756_v16, %v789_v58 }
  0xaf   : > { %v915_v6 = vadd.f32 %v883_v3, %v849_v2  ;;  %v1689_v3 = vld [vmem:[%s3343_s10 + $0x18] sm:$0xff] }
  0xb0   : > { %1799 = vmatpush.msra.mxu3 %v1689_v3 }
  0xb1   : > { %v651_v7 = vpop.f32.mrf.mxu0  ;;  %2238 = vmatmul.msk.f32.gmra.mxu2 %vm524_vm1, %v915_v6  ;;  %v1687_v6 = vld [vmem:[%s3343_s10 + $0x8] sm:$0xff] }
  0xb2   : > { %v2357_v11 = vpop.eup %2356  ;;  %v652_v12 = vadd.f32 %v2797_v42, %v651_v7  ;;  %v784_v7 = vld [vmem:[%s2750_s12 + $0x70] sm:$0xff] }
  0xb3   : > { %2194 = vmatmul.msk.f32.gmra.mxu1 %vm939_vm3, %v2357_v11 }
  0xb4   : > { %2358 = vtanh.f32 %v652_v12  ;;  %2178 = vmatmul.msk.f32.gmra.mxu0 %vm524_vm1, %v506_v8  ;;  %v817_v8 = vld [vmem:[%s2744_s28 + $0x70] sm:$0xff]  ;;  %v884_v12 = vmul.f32 %v2756_v16, %v784_v7  ;;  %v790_v7 = vld [vmem:[%s2750_s12 + $0xa0] sm:$0xff] }
  0xb5   : > { %v850_v11 = vmul.f32 %v2754_v15, %v817_v8  ;;  %v823_v8 = vld [vmem:[%s2744_s28 + $0xa0] sm:$0xff] }
  0xb7   : > { %v916_v17 = vadd.f32 %v884_v12, %v850_v11  ;;  %v890_v11 = vmul.f32 %v2756_v16, %v790_v7 }
  0xb9   : > { %v654_v18 = vpop.f32.mrf.mxu0  ;;  %2239 = vmatmul.msk.f32.gmra.mxu2 %vm524_vm1, %v916_v17 }
  0xba   : > { %v2359_v22 = vpop.eup %2358  ;;  %v655_v23 = vadd.f32 %v2797_v42, %v654_v18  ;;  %v785_v18 = vld [vmem:[%s2750_s12 + $0x78] sm:$0xff] }
  0xbb   : > { %2195 = vmatmul.msk.f32.gmra.mxu1 %vm939_vm3, %v2359_v22 }
  0xbc   : > { %2360 = vtanh.f32 %v655_v23  ;;  %2179 = vmatmul.msk.f32.gmra.mxu0 %vm524_vm1, %v507_v19  ;;  %v818_v19 = vld [vmem:[%s2744_s28 + $0x78] sm:$0xff]  ;;  %v885_v23 = vmul.f32 %v2756_v16, %v785_v18  ;;  %v2976_v18 = vld [vmem:[%s2813_s30] ss:$0 sm:$0xff] }
  0xbd   : > { %v851_v22 = vmul.f32 %v2754_v15, %v818_v19 }
  0xbf   : > { %v917_v26 = vadd.f32 %v885_v23, %v851_v22  ;;  %v824_v22 = vld [vmem:[%s2744_s28 + $0xa8] sm:$0xff] }
  0xc1   : > { %v657_v27 = vpop.f32.mrf.mxu0  ;;  %2240 = vmatmul.msk.f32.gmra.mxu2 %vm524_vm1, %v917_v26 }
  0xc2   : > { %v2361_v31 = vpop.eup %2360  ;;  %v658_v32 = vadd.f32 %v2797_v42, %v657_v27  ;;  %v786_v27 = vld [vmem:[%s2750_s12 + $0x80] sm:$0xff] }
  0xc3   : > { %2196 = vmatmul.msk.f32.gmra.mxu1 %vm939_vm3, %v2361_v31 }
  0xc4   : > { %2362 = vtanh.f32 %v658_v32  ;;  %2180 = vmatmul.msk.f32.gmra.mxu0 %vm524_vm1, %v508_v28  ;;  %v819_v28 = vld [vmem:[%s2744_s28 + $0x80] sm:$0xff]  ;;  %v886_v32 = vmul.f32 %v2756_v16, %v786_v27 }
  0xc5   : > { %v852_v31 = vmul.f32 %v2754_v15, %v819_v28 }
  0xc7   : > { %v918_v35 = vadd.f32 %v886_v32, %v852_v31 }
  0xc9   : > { %v660_v36 = vpop.f32.mrf.mxu0  ;;  %2241 = vmatmul.msk.f32.gmra.mxu2 %vm524_vm1, %v918_v35  ;;  %v792_v35 = vld [vmem:[%s2750_s12 + $0xb0] sm:$0xff] }
  0xca   : > { %v2363_v40 = vpop.eup %2362  ;;  %v661_v41 = vadd.f32 %v2797_v42, %v660_v36  ;;  %v2921_v36 = vpop.f32.mrf.mxu2 }
  0xcb   : > { %2197 = vmatmul.msk.f32.gmra.mxu1 %vm939_vm3, %v2363_v40  ;;  %v516_v40 = vld [vmem:[%s2712_s22 + $0xe8] sm:$0xff] }
  0xcc   : > { %2364 = vtanh.f32 %v661_v41  ;;  %2181 = vmatmul.msk.f32.gmra.mxu0 %vm524_vm1, %v509_v37  ;;  %v787_v37 = vld [vmem:[%s2750_s12 + $0x88] sm:$0xff]  ;;  %v853_v41 = vmul.f32 %v2754_v15, %v820_v38 }
  0xcd   : > { %v887_v43 = vmul.f32 %v2756_v16, %v787_v37 }
  0xd1   : > { %v663_v46 = vpop.f32.mrf.mxu0 }
  0xd2   : > { %v2365_v50 = vpop.eup %2364  ;;  %v664_v51 = vadd.f32 %v2797_v42, %v663_v46  ;;  %v919_v46 = vadd.f32 %v887_v43, %v853_v41  ;;  %v892_v41 = vmul.f32 %v2756_v16, %v792_v35  ;;  %v795_v35 = vld [vmem:[%s2750_s12 + $0xc8] sm:$0xff] }
  0xd3   : > { %2198 = vmatmul.msk.f32.gmra.mxu1 %vm939_vm3, %v2365_v50 }
  0xd4   : > { %2366 = vtanh.f32 %v664_v51  ;;  %2182 = vmatmul.msk.f32.gmra.mxu0 %vm524_vm1, %v510_v47  ;;  %2242 = vmatmul.msk.f32.gmra.mxu2 %vm524_vm1, %v919_v46  ;;  %v2932_v47 = vpop.f32.mrf.mxu2  ;;  %v517_v51 = vld [vmem:[%s2712_s22 + $0xf0] sm:$0xff]  ;;  %s2597_s22 = smov [#allocation7]  }
  0xd9   : > { %v666_v55 = vpop.f32.mrf.mxu0 }
  0xda   : > { %v2367_v59 = vpop.eup %2366  ;;  %v667_v60 = vadd.f32 %v2797_v42, %v666_v55 }
  0xdb   : > { %2199 = vmatmul.msk.f32.gmra.mxu1 %vm939_vm3, %v2367_v59  ;;  %v822_v59 = vld [vmem:[%s2744_s28 + $0x98] sm:$0xff] }
  0xdc   : > { %2368 = vtanh.f32 %v667_v60  ;;  %2183 = vmatmul.msk.f32.gmra.mxu0 %vm524_vm1, %v511_v56  ;;  %v920_v56 = vadd.f32 %v888_v53, %v854_v52  ;;  %v2943_v57 = vpop.f32.mrf.mxu2  ;;  %v855_v62 = vmul.f32 %v2754_v15, %v822_v59  ;;  %v793_v53 = vld [vmem:[%s2750_s12 + $0xb8] sm:$0xff] }
  0xde   : > { %2243 = vmatmul.msk.f32.gmra.mxu2 %vm524_vm1, %v920_v56  ;;  %v921_v2 = vadd.f32 %v889_v63, %v855_v62 }
  0xe1   : > { %v669_v0 = vpop.f32.mrf.mxu0 }
  0xe2   : > { %v2369_v4 = vpop.eup %2368  ;;  %v670_v5 = vadd.f32 %v2797_v42, %v669_v0 }
  0xe3   : > { %2200 = vmatmul.msk.f32.gmra.mxu1 %vm939_vm3, %v2369_v4  ;;  %v1688_v4 = vld [vmem:[%s3343_s10 + $0x10] sm:$0xff] }
  0xe4   : > { %2370 = vtanh.f32 %v670_v5  ;;  %2184 = vmatmul.msk.f32.gmra.mxu0 %vm524_vm1, %v512_v1  ;;  %1800 = vmatpush.msra.mxu3 %v1688_v4  ;;  %v2960_v5 = vpop.f32.mrf.mxu2 }
  0xe6   : > { %2244 = vmatmul.msk.f32.gmra.mxu2 %vm524_vm1, %v921_v2  ;;  %1801 = vmatpush.msra.mxu3 %v1687_v6 }
  0xe9   : > { %v672_v9 = vpop.f32.mrf.mxu0 }
  0xea   : > { %v2371_v13 = vpop.eup %2370  ;;  %v673_v14 = vadd.f32 %v2797_v42, %v672_v9 }
  0xeb   : > { %2201 = vmatmul.msk.f32.gmra.mxu1 %vm939_vm3, %v2371_v13 }
  0xec   : > { %2372 = vtanh.f32 %v673_v14  ;;  %2185 = vmatmul.msk.f32.gmra.mxu0 %vm524_vm1, %v513_v10  ;;  %v856_v10 = vmul.f32 %v2754_v15, %v823_v8  ;;  %v1686_v14 = vld [vmem:[%s3343_s10] sm:$0xff] }
  0xed   : > { %1802 = vmatpush.msra.mxu3 %v1686_v14 }
  0xee   : > { %v922_v17 = vadd.f32 %v890_v11, %v856_v10  ;;  %v794_v10 = vld [vmem:[%s2750_s12 + $0xc0] sm:$0xff] }
  0xef   : > { %v827_v11 = vld [vmem:[%s2744_s28 + $0xc0] sm:$0xff] }
  0xf0   : > { %2245 = vmatmul.msk.f32.gmra.mxu2 %vm524_vm1, %v922_v17  ;;  %v860_v17 = vmul.f32 %v2754_v15, %v827_v11 }
  0xf1   : > { %v675_v20 = vpop.f32.mrf.mxu0 }
  0xf2   : > { %v2373_v24 = vpop.eup %2372  ;;  %v676_v25 = vadd.f32 %v2797_v42, %v675_v20  ;;  %v2978_v20 = vpop.f32.mrf.mxu2 }
  0xf3   : > { %2202 = vmatmul.msk.f32.gmra.mxu1 %vm939_vm3, %v2373_v24 }
  0xf4   : > { %2374 = vtanh.f32 %v676_v25  ;;  %2186 = vmatmul.msk.f32.gmra.mxu0 %vm524_vm1, %v514_v21  ;;  %v791_v21 = vld [vmem:[%s2750_s12 + $0xa8] sm:$0xff]  ;;  %v857_v25 = vmul.f32 %v2754_v15, %v824_v22 }
  0xf5   : > { %v891_v26 = vmul.f32 %v2756_v16, %v791_v21 }
  0xf9   : > { %v678_v29 = vpop.f32.mrf.mxu0 }
  0xfa   : > { %v2375_v33 = vpop.eup %2374  ;;  %v679_v34 = vadd.f32 %v2797_v42, %v678_v29 }
  0xfb   : > { %2203 = vmatmul.msk.f32.gmra.mxu1 %vm939_vm3, %v2375_v33 }
  0xfc   : > { %2376 = vtanh.f32 %v679_v34  ;;  %2187 = vmatmul.msk.f32.gmra.mxu0 %vm524_vm1, %v515_v30  ;;  %v923_v30 = vadd.f32 %v891_v26, %v857_v25  ;;  %v2994_v34 = vpop.f32.mrf.mxu2 }
  0xfe   : > { %2246 = vmatmul.msk.f32.gmra.mxu2 %vm524_vm1, %v923_v30 }
 0x101   : > { %v681_v39 = vpop.f32.mrf.mxu0 }
 0x102   : > { %v2377_v44 = vpop.eup %2376  ;;  %v682_v45 = vadd.f32 %v2797_v42, %v681_v39 }
 0x103   : > { %2204 = vmatmul.msk.f32.gmra.mxu1 %vm939_vm3, %v2377_v44 }
 0x104   : > { %2378 = vtanh.f32 %v682_v45  ;;  %2188 = vmatmul.msk.f32.gmra.mxu0 %vm524_vm1, %v516_v40  ;;  %v3011_v52 = vpop.f32.mrf.mxu2 }
 0x109   : > { %v684_v50 = vpop.f32.mrf.mxu0 }
 0x10a   : > { %v2379_v54 = vpop.eup %2378  ;;  %v685_v55 = vadd.f32 %v2797_v42, %v684_v50 }
 0x10b   : > { %2205 = vmatmul.msk.f32.gmra.mxu1 %vm939_vm3, %v2379_v54  ;;  %v826_v54 = vld [vmem:[%s2744_s28 + $0xb8] sm:$0xff] }
 0x10c   : > { %2380 = vtanh.f32 %v685_v55  ;;  %2189 = vmatmul.msk.f32.gmra.mxu0 %vm524_vm1, %v517_v51  ;;  %v859_v59 = vmul.f32 %v2754_v15, %v826_v54 }
 0x111   : > { %v687_v60 = vpop.f32.mrf.mxu0 }
 0x112   : > { %v2381_v0 = vpop.eup %2380  ;;  %v688_v1 = vadd.f32 %v2797_v42, %v687_v60  ;;  %v893_v60 = vmul.f32 %v2756_v16, %v793_v53 }
 0x113   : > { %2206 = vmatmul.msk.f32.gmra.mxu1 %vm939_vm3, %v2381_v0 }
 0x114   : > { %2382 = vtanh.f32 %v688_v1  ;;  %2190 = vmatmul.msk.f32.gmra.mxu0 %vm524_vm1, %v518_v61  ;;  %v925_v1 = vadd.f32 %v893_v60, %v859_v59  ;;  %v829_v59 = vld [vmem:[%s2744_s28 + $0xd0] sm:$0xff] }
 0x119   : > { %v690_v9 = vpop.f32.mrf.mxu0 }
 0x11a   : > { %v2383_v12 = vpop.eup %2382  ;;  %v691_v13 = vadd.f32 %v2797_v42, %v690_v9  ;;  %v3028_v9 = vpop.f32.mrf.mxu2 }
 0x11b   : > { %2207 = vmatmul.msk.f32.gmra.mxu1 %vm939_vm3, %v2383_v12 }
 0x11c   : > { %2384 = vtanh.f32 %v691_v13 }
 0x120   : > { %v1057_v19 = vpop.f32.mrf.mxu1 }
 0x121   : > { %v1270_v23 = vadd.f32 %v2921_v36, %v1057_v19  ;;  %v693_v24 = vpop.f32.mrf.mxu0  ;;  %v825_v36 = vld [vmem:[%s2744_s28 + $0xb0] sm:$0xff]  ;;  %v894_v19 = vmul.f32 %v2756_v16, %v794_v10 }
 0x122   : > { %v2385_v27 = vpop.eup %2384  ;;  %v694_v28 = vadd.f32 %v2797_v42, %v693_v24  ;;  %v858_v40 = vmul.f32 %v2754_v15, %v825_v36  ;;  %v828_v36 = vld [vmem:[%s2744_s28 + $0xc8] sm:$0xff] }
 0x123   : > { %v2987_v29 = vadd.f32 %v2976_v18, %v1270_v23  ;;  %2208 = vmatmul.msk.f32.gmra.mxu1 %vm939_vm3, %v2385_v27  ;;  %v926_v25 = vadd.f32 %v894_v19, %v860_v17  ;;  %v797_v17 = vld [vmem:[%s2750_s12 + $0xd8] sm:$0xff] }
 0x124   : > { %2386 = vtanh.f32 %v694_v28  ;;  %v924_v48 = vadd.f32 %v892_v41, %v858_v40  ;;  %v861_v40 = vmul.f32 %v2754_v15, %v828_v36  ;;  %v895_v41 = vmul.f32 %v2756_v16, %v795_v35  ;;  %v830_v19 = vld [vmem:[%s2744_s28 + $0xd8] sm:$0xff] }
 0x125   : > { %v1398_v31 = vmul.f32 %v2987_v29, %v2987_v29 }
 0x126   : > { %2247 = vmatmul.msk.f32.gmra.mxu2 %vm524_vm1, %v924_v48 }
 0x127   : > { %v1430_v32 = vmul.f32 %v1398_v31, %v2987_v29 }
 0x128   : > { %v1060_v33 = vpop.f32.mrf.mxu1 }
 0x129   : > { %v1273_v37 = vadd.f32 %v2932_v47, %v1060_v33  ;;  %v696_v38 = vpop.f32.mrf.mxu0  ;;  %v1462_v39 = vmul.f32 0.044715, %v1430_v32  ;;  %v3047_v33 = vpop.f32.mrf.mxu2 }
 0x12a   : > { %v2387_v43 = vpop.eup %2386  ;;  %v697_v44 = vadd.f32 %v2797_v42, %v696_v38 }
 0x12b   : > { %v3003_v45 = vadd.f32 %v2976_v18, %v1273_v37  ;;  %2209 = vmatmul.msk.f32.gmra.mxu1 %vm939_vm3, %v2387_v43  ;;  %v1494_v46 = vadd.f32 %v1462_v39, %v2987_v29 }
 0x12c   : > { %2388 = vtanh.f32 %v697_v44 }
 0x12d   : > { %v1399_v47 = vmul.f32 %v3003_v45, %v3003_v45  ;;  %v1526_v49 = vmul.f32 0.7978846, %v1494_v46 }
 0x12e   : > { %2248 = vmatmul.msk.f32.gmra.mxu2 %vm524_vm1, %v925_v1 }
 0x12f   : > { %2390 = vtanh.f32 %v1526_v49  ;;  %v1431_v50 = vmul.f32 %v1399_v47, %v3003_v45  ;;  %v927_v47 = vadd.f32 %v895_v41, %v861_v40  ;;  %v798_v40 = vld [vmem:[%s2750_s12 + $0xe0] sm:$0xff] }
 0x130   : > { %v1063_v51 = vpop.f32.mrf.mxu1  ;;  %v831_v41 = vld [vmem:[%s2744_s28 + $0xe0] sm:$0xff] }
 0x131   : > { %v1276_v55 = vadd.f32 %v2943_v57, %v1063_v51  ;;  %v699_v56 = vpop.f32.mrf.mxu0  ;;  %v1463_v58 = vmul.f32 0.044715, %v1431_v50 }
 0x132   : > { %v2389_v61 = vpop.eup %2388  ;;  %v700_v62 = vadd.f32 %v2797_v42, %v699_v56  ;;  %v3066_v56 = vpop.f32.mrf.mxu2 }
 0x133   : > { %v3020_v63 = vadd.f32 %v2976_v18, %v1276_v55  ;;  %2210 = vmatmul.msk.f32.gmra.mxu1 %vm939_vm3, %v2389_v61  ;;  %v1495_v0 = vadd.f32 %v1463_v58, %v3003_v45  ;;  %v796_v58 = vld [vmem:[%s2750_s12 + $0xd0] sm:$0xff] }
 0x134   : > { %2392 = vtanh.f32 %v700_v62  ;;  %v896_v1 = vmul.f32 %v2756_v16, %v796_v58 }
 0x135   : > { %v2391_v57 = vpop.eup %2390  ;;  %v1400_v2 = vmul.f32 %v3020_v63, %v3020_v63  ;;  %v1527_v3 = vmul.f32 0.7978846, %v1495_v0  ;;  %v862_v0 = vmul.f32 %v2754_v15, %v829_v59 }
 0x136   : > { %v1590_v4 = vadd.f32 1.0, %v2391_v57  ;;  %2249 = vmatmul.msk.f32.gmra.mxu2 %vm524_vm1, %v926_v25  ;;  %v897_v25 = vmul.f32 %v2756_v16, %v797_v17 }
 0x137   : > { %2394 = vtanh.f32 %v1527_v3  ;;  %v1432_v6 = vmul.f32 %v1400_v2, %v3020_v63 }
 0x138   : > { %v1066_v7 = vpop.f32.mrf.mxu1  ;;  %v1622_v8 = vmul.f32 0.5, %v1590_v4 }
 0x139   : > { %v1279_v12 = vadd.f32 %v2960_v5, %v1066_v7  ;;  %v702_v13 = vpop.f32.mrf.mxu0  ;;  %v1464_v14 = vmul.f32 0.044715, %v1432_v6  ;;  %v928_v6 = vadd.f32 %v896_v1, %v862_v0  ;;  %v799_v0 = vld [vmem:[%s2750_s12 + $0xe8] sm:$0xff] }
 0x13a   : > { %v2393_v21 = vpop.eup %2392  ;;  %v703_v22 = vadd.f32 %v2797_v42, %v702_v13  ;;  %v1654_v23 = vmul.f32 %v1622_v8, %v2987_v29  ;;  %v832_v1 = vld [vmem:[%s2744_s28 + $0xe8] sm:$0xff] }
 0x13b   : > { %v3038_v24 = vadd.f32 %v2976_v18, %v1279_v12  ;;  %2211 = vmatmul.msk.f32.gmra.mxu1 %vm939_vm3, %v2393_v21  ;;  %v1496_v5 = vadd.f32 %v1464_v14, %v3020_v63  ;;  %v3085_v14 = vpop.f32.mrf.mxu2 }
 0x13c   : > { %2396 = vtanh.f32 %v703_v22  ;;  %2257 = vmatmul.msk.f32.vlgmr.msra.gmra.mxu3 %vm1690_vm4, %v1654_v23 }
 0x13d   : > { %v2395_v26 = vpop.eup %2394  ;;  %v1401_v27 = vmul.f32 %v3038_v24, %v3038_v24  ;;  %v1528_v28 = vmul.f32 0.7978846, %v1496_v5  ;;  %v863_v5 = vmul.f32 %v2754_v15, %v830_v19 }
 0x13e   : > { %v1591_v29 = vadd.f32 1.0, %v2395_v26  ;;  %2250 = vmatmul.msk.f32.gmra.mxu2 %vm524_vm1, %v927_v47  ;;  %v898_v47 = vmul.f32 %v2756_v16, %v798_v40 }
 0x13f   : > { %2398 = vtanh.f32 %v1528_v28  ;;  %v1433_v30 = vmul.f32 %v1401_v27, %v3038_v24 }
 0x140   : > { %v1069_v31 = vpop.f32.mrf.mxu1  ;;  %v1623_v32 = vmul.f32 0.5, %v1591_v29 }
 0x141   : > { %v1282_v37 = vadd.f32 %v2978_v20, %v1069_v31  ;;  %v705_v38 = vpop.f32.mrf.mxu0  ;;  %v1465_v39 = vmul.f32 0.044715, %v1433_v30  ;;  %v929_v30 = vadd.f32 %v897_v25, %v863_v5  ;;  %v800_v5 = vld [vmem:[%s2750_s12 + $0xf0] sm:$0xff] }
 0x142   : > { %v2397_v43 = vpop.eup %2396  ;;  %v706_v44 = vadd.f32 %v2797_v42, %v705_v38  ;;  %v1655_v46 = vmul.f32 %v1623_v32, %v3003_v45  ;;  %v833_v25 = vld [vmem:[%s2744_s28 + $0xf0] sm:$0xff] }
 0x143   : > { %v3057_v48 = vadd.f32 %v2976_v18, %v1282_v37  ;;  %2212 = vmatmul.msk.f32.gmra.mxu1 %vm939_vm3, %v2397_v43  ;;  %v1497_v20 = vadd.f32 %v1465_v39, %v3038_v24  ;;  %v3104_v39 = vpop.f32.mrf.mxu2 }
 0x144   : > { %2400 = vtanh.f32 %v706_v44  ;;  %2258 = vmatmul.msk.f32.gmra.mxu3 %vm1690_vm4, %v1655_v46 }
 0x145   : > { %v2399_v49 = vpop.eup %2398  ;;  %v1402_v50 = vmul.f32 %v3057_v48, %v3057_v48  ;;  %v1529_v51 = vmul.f32 0.7978846, %v1497_v20  ;;  %v864_v20 = vmul.f32 %v2754_v15, %v831_v41 }
 0x146   : > { %v1592_v45 = vadd.f32 1.0, %v2399_v49  ;;  %2251 = vmatmul.msk.f32.gmra.mxu2 %vm524_vm1, %v928_v6  ;;  %v899_v6 = vmul.f32 %v2756_v16, %v799_v0 }
 0x147   : > { %2402 = vtanh.f32 %v1529_v51  ;;  %v1434_v53 = vmul.f32 %v1402_v50, %v3057_v48 }
 0x148   : > { %v1072_v54 = vpop.f32.mrf.mxu1  ;;  %v1624_v55 = vmul.f32 0.5, %v1592_v45 }
 0x149   : > { %v1285_v60 = vadd.f32 %v2994_v34, %v1072_v54  ;;  %v708_v61 = vpop.f32.mrf.mxu0  ;;  %v1466_v62 = vmul.f32 0.044715, %v1434_v53  ;;  %v930_v53 = vadd.f32 %v898_v47, %v864_v20  ;;  %v801_v20 = vld [vmem:[%s2750_s12 + $0xf8] sm:$0xff] }
 0x14a   : > { %v2401_v57 = vpop.eup %2400  ;;  %v709_v2 = vadd.f32 %v2797_v42, %v708_v61  ;;  %v1656_v3 = vmul.f32 %v1624_v55, %v3020_v63  ;;  %v834_v47 = vld [vmem:[%s2744_s28 + $0xf8] sm:$0xff] }
 0x14b   : > { %v3076_v4 = vadd.f32 %v2976_v18, %v1285_v60  ;;  %2213 = vmatmul.msk.f32.gmra.mxu1 %vm939_vm3, %v2401_v57  ;;  %v1498_v34 = vadd.f32 %v1466_v62, %v3057_v48  ;;  %v3123_v62 = vpop.f32.mrf.mxu2 }
 0x14c   : > { %2404 = vtanh.f32 %v709_v2  ;;  %2259 = vmatmul.msk.f32.gmra.mxu3 %vm1690_vm4, %v1656_v3 }
 0x14d   : > { %v2403_v7 = vpop.eup %2402  ;;  %v1403_v8 = vmul.f32 %v3076_v4, %v3076_v4  ;;  %v1530_v10 = vmul.f32 0.7978846, %v1498_v34  ;;  %v865_v34 = vmul.f32 %v2754_v15, %v832_v1 }
 0x14e   : > { %v1593_v63 = vadd.f32 1.0, %v2403_v7  ;;  %2252 = vmatmul.msk.f32.gmra.mxu2 %vm524_vm1, %v929_v30  ;;  %v900_v30 = vmul.f32 %v2756_v16, %v800_v5 }
 0x14f   : > { %2406 = vtanh.f32 %v1530_v10  ;;  %v1435_v11 = vmul.f32 %v1403_v8, %v3076_v4 }
 0x150   : > { %v1075_v12 = vpop.f32.mrf.mxu1  ;;  %v1625_v13 = vmul.f32 0.5, %v1593_v63 }
 0x151   : > { %v1288_v21 = vadd.f32 %v3011_v52, %v1075_v12  ;;  %v711_v22 = vpop.f32.mrf.mxu0  ;;  %v1467_v23 = vmul.f32 0.044715, %v1435_v11  ;;  %v931_v11 = vadd.f32 %v899_v6, %v865_v34 }
 0x152   : > { %v2405_v26 = vpop.eup %2404  ;;  %v712_v27 = vadd.f32 %v2797_v42, %v711_v22  ;;  %v1657_v28 = vmul.f32 %v1625_v13, %v3038_v24 }
 0x153   : > { %v3095_v29 = vadd.f32 %v2976_v18, %v1288_v21  ;;  %2214 = vmatmul.msk.f32.gmra.mxu1 %vm939_vm3, %v2405_v26  ;;  %v1499_v52 = vadd.f32 %v1467_v23, %v3076_v4  ;;  %v3142_v23 = vpop.f32.mrf.mxu2 }
 0x154   : > { %2408 = vtanh.f32 %v712_v27  ;;  %2260 = vmatmul.msk.f32.gmra.mxu3 %vm1690_vm4, %v1657_v28 }
 0x155   : > { %v2407_v31 = vpop.eup %2406  ;;  %v1404_v32 = vmul.f32 %v3095_v29, %v3095_v29  ;;  %v1531_v35 = vmul.f32 0.7978846, %v1499_v52  ;;  %v866_v52 = vmul.f32 %v2754_v15, %v833_v25  ;;  %v2480_v25 = vld [vmem:[%s3340_s7] ss:$0 sm:$0xff] }
 0x156   : > { %v1594_v24 = vadd.f32 1.0, %v2407_v31  ;;  %2253 = vmatmul.msk.f32.gmra.mxu2 %vm524_vm1, %v930_v53  ;;  %v901_v53 = vmul.f32 %v2756_v16, %v801_v20 }
 0x157   : > { %2410 = vtanh.f32 %v1531_v35  ;;  %v1436_v36 = vmul.f32 %v1404_v32, %v3095_v29 }
 0x158   : > { %v1078_v37 = vpop.f32.mrf.mxu1  ;;  %v1626_v38 = vmul.f32 0.5, %v1594_v24 }
 0x159   : > { %v1291_v43 = vadd.f32 %v3028_v9, %v1078_v37  ;;  %v714_v44 = vpop.f32.mrf.mxu0  ;;  %v1468_v46 = vmul.f32 0.044715, %v1436_v36 }
 0x15a   : > { %v2409_v49 = vpop.eup %2408  ;;  %v715_v50 = vadd.f32 %v2797_v42, %v714_v44  ;;  %v1658_v51 = vmul.f32 %v1626_v38, %v3057_v48 }
 0x15b   : > { %v3114_v45 = vadd.f32 %v2976_v18, %v1291_v43  ;;  %2215 = vmatmul.msk.f32.gmra.mxu1 %vm939_vm3, %v2409_v49  ;;  %v1500_v9 = vadd.f32 %v1468_v46, %v3095_v29  ;;  %v3161_v46 = vpop.f32.mrf.mxu2 }
 0x15c   : > { %2412 = vtanh.f32 %v715_v50  ;;  %2261 = vmatmul.msk.f32.gmra.mxu3 %vm1690_vm4, %v1658_v51 }
 0x15d   : > { %v2411_v54 = vpop.eup %2410  ;;  %v1405_v55 = vmul.f32 %v3114_v45, %v3114_v45  ;;  %v1532_v58 = vmul.f32 0.7978846, %v1500_v9  ;;  %v867_v9 = vmul.f32 %v2754_v15, %v834_v47 }
 0x15e   : > { %v1595_v48 = vadd.f32 1.0, %v2411_v54  ;;  %2254 = vmatmul.msk.f32.gmra.mxu2 %vm524_vm1, %v931_v11 }
 0x15f   : > { %2414 = vtanh.f32 %v1532_v58  ;;  %v1437_v59 = vmul.f32 %v1405_v55, %v3114_v45 }
 0x160   : > { %v1081_v60 = vpop.f32.mrf.mxu1  ;;  %v1627_v61 = vmul.f32 0.5, %v1595_v48 }
 0x161   : > { %v1294_v57 = vadd.f32 %v3047_v33, %v1081_v60  ;;  %v717_v2 = vpop.f32.mrf.mxu0  ;;  %v1469_v3 = vmul.f32 0.044715, %v1437_v59  ;;  %v933_v60 = vadd.f32 %v901_v53, %v867_v9 }
 0x162   : > { %v2413_v7 = vpop.eup %2412  ;;  %v718_v8 = vadd.f32 %v2797_v42, %v717_v2  ;;  %v1659_v10 = vmul.f32 %v1627_v61, %v3076_v4 }
 0x163   : > { %v3133_v63 = vadd.f32 %v2976_v18, %v1294_v57  ;;  %2216 = vmatmul.msk.f32.gmra.mxu1 %vm939_vm3, %v2413_v7  ;;  %v1501_v33 = vadd.f32 %v1469_v3, %v3114_v45  ;;  %v3175_v57 = vpop.f32.mrf.mxu2 }
 0x164   : > { %2416 = vtanh.f32 %v718_v8  ;;  %2262 = vmatmul.msk.f32.gmra.mxu3 %vm1690_vm4, %v1659_v10 }
 0x165   : > { %v2415_v12 = vpop.eup %2414  ;;  %v1406_v13 = vmul.f32 %v3133_v63, %v3133_v63  ;;  %v1533_v17 = vmul.f32 0.7978846, %v1501_v33 }
 0x166   : > { %v1596_v4 = vadd.f32 1.0, %v2415_v12 }
 0x167   : > { %v1438_v19 = vmul.f32 %v1406_v13, %v3133_v63  ;;  %2418 = vtanh.f32 %v1533_v17 }
 0x168   : > { %v1084_v21 = vpop.f32.mrf.mxu1  ;;  %v1628_v22 = vmul.f32 0.5, %v1596_v4 }
 0x169   : > { %v1470_v26 = vmul.f32 0.044715, %v1438_v19  ;;  %v1297_v27 = vadd.f32 %v3066_v56, %v1084_v21  ;;  %v720_v28 = vpop.f32.mrf.mxu0  ;;  %v932_v56 = vadd.f32 %v900_v30, %v866_v52 }
 0x16a   : > { %v2417_v31 = vpop.eup %2416  ;;  %v721_v32 = vadd.f32 %v2797_v42, %v720_v28  ;;  %v1660_v35 = vmul.f32 %v1628_v22, %v3095_v29 }
 0x16b   : > { %v3152_v24 = vadd.f32 %v2976_v18, %v1297_v27  ;;  %2217 = vmatmul.msk.f32.gmra.mxu1 %vm939_vm3, %v2417_v31  ;;  %v1502_v36 = vadd.f32 %v1470_v26, %v3133_v63  ;;  %2255 = vmatmul.msk.f32.gmra.mxu2 %vm524_vm1, %v932_v56  ;;  %v3183_v21 = vpop.f32.mrf.mxu2 }
 0x16c   : > { %2420 = vtanh.f32 %v721_v32  ;;  %2263 = vmatmul.msk.f32.gmra.mxu3 %vm1690_vm4, %v1660_v35 }
 0x16d   : > { %v2419_v37 = vpop.eup %2418  ;;  %v1407_v38 = vmul.f32 %v3152_v24, %v3152_v24  ;;  %v1534_v40 = vmul.f32 0.7978846, %v1502_v36 }
 0x16e   : > { %v1597_v29 = vadd.f32 1.0, %v2419_v37 }
 0x16f   : > { %v1439_v41 = vmul.f32 %v1407_v38, %v3152_v24  ;;  %2422 = vtanh.f32 %v1534_v40 }
 0x170   : > { %v1087_v43 = vpop.f32.mrf.mxu1  ;;  %v1629_v44 = vmul.f32 0.5, %v1597_v29 }
 0x171   : > { %v1471_v49 = vmul.f32 0.044715, %v1439_v41  ;;  %v1300_v50 = vadd.f32 %v3085_v14, %v1087_v43  ;;  %v723_v51 = vpop.f32.mrf.mxu0 }
 0x172   : > { %v2421_v54 = vpop.eup %2420  ;;  %v724_v55 = vadd.f32 %v2797_v42, %v723_v51  ;;  %v1661_v58 = vmul.f32 %v1629_v44, %v3114_v45 }
 0x173   : > { %v1376_v48 = vadd.f32 %v2976_v18, %v1300_v50  ;;  %2218 = vmatmul.msk.f32.gmra.mxu1 %vm939_vm3, %v2421_v54  ;;  %v1503_v59 = vadd.f32 %v1471_v49, %v3152_v24  ;;  %2256 = vmatmul.msk.f32.gmra.mxu2 %vm524_vm1, %v933_v60  ;;  %v3194_v43 = vpop.f32.mrf.mxu2 }
 0x174   : > { %2424 = vtanh.f32 %v724_v55  ;;  %2264 = vmatmul.msk.f32.gmra.mxu3 %vm1690_vm4, %v1661_v58 }
 0x175   : > { %v2423_v14 = vpop.eup %2422  ;;  %v1408_v61 = vmul.f32 %v1376_v48, %v1376_v48  ;;  %v1535_v15 = vmul.f32 0.7978846, %v1503_v59 }
 0x176   : > { %v1598_v16 = vadd.f32 1.0, %v2423_v14 }
 0x177   : > { %v1440_v0 = vmul.f32 %v1408_v61, %v1376_v48  ;;  %2426 = vtanh.f32 %v1535_v15 }
 0x178   : > { %v1090_v1 = vpop.f32.mrf.mxu1  ;;  %v1630_v45 = vmul.f32 0.5, %v1598_v16 }
 0x179   : > { %v1472_v2 = vmul.f32 0.044715, %v1440_v0  ;;  %v1303_v3 = vadd.f32 %v3104_v39, %v1090_v1  ;;  %v726_v34 = vpop.f32.mrf.mxu0 }
 0x17a   : > { %v2425_v6 = vpop.eup %2424  ;;  %v727_v7 = vadd.f32 %v2797_v42, %v726_v34  ;;  %v1662_v8 = vmul.f32 %v1630_v45, %v3133_v63 }
 0x17b   : > { %v1377_v10 = vadd.f32 %v2976_v18, %v1303_v3  ;;  %2219 = vmatmul.msk.f32.gmra.mxu1 %vm939_vm3, %v2425_v6  ;;  %v1504_v33 = vadd.f32 %v1472_v2, %v1376_v48  ;;  %v1323_v15 = vpop.f32.mrf.mxu2 }
 0x17c   : > { %2428 = vtanh.f32 %v727_v7  ;;  %2265 = vmatmul.msk.f32.gmra.mxu3 %vm1690_vm4, %v1662_v8 }
 0x17d   : > { %v2427_v11 = vpop.eup %2426  ;;  %v1409_v12 = vmul.f32 %v1377_v10, %v1377_v10  ;;  %v1536_v13 = vmul.f32 0.7978846, %v1504_v33 }
 0x17e   : > { %v1599_v17 = vadd.f32 1.0, %v2427_v11 }
 0x17f   : > { %v1441_v4 = vmul.f32 %v1409_v12, %v1377_v10  ;;  %2430 = vtanh.f32 %v1536_v13 }
 0x180   : > { %v1093_v39 = vpop.f32.mrf.mxu1  ;;  %v1631_v19 = vmul.f32 0.5, %v1599_v17 }
 0x181   : > { %v1473_v42 = vmul.f32 0.044715, %v1441_v4  ;;  %v1306_v63 = vadd.f32 %v3123_v62, %v1093_v39  ;;  %v729_v22 = vpop.f32.mrf.mxu0 }
 0x182   : > { %v2429_v5 = vpop.eup %2428  ;;  %v730_v26 = vadd.f32 %v2480_v25, %v729_v22  ;;  %v1663_v27 = vmul.f32 %v1631_v19, %v3152_v24 }
 0x183   : > { %v1378_v28 = vadd.f32 %v2976_v18, %v1306_v63  ;;  %2220 = vmatmul.msk.f32.gmra.mxu1 %vm939_vm3, %v2429_v5  ;;  %v1505_v52 = vadd.f32 %v1473_v42, %v1377_v10  ;;  %v1326_v4 = vpop.f32.mrf.mxu2 }
 0x184   : > { %2432 = vtanh.f32 %v730_v26  ;;  %2266 = vmatmul.msk.f32.gmra.mxu3 %vm1690_vm4, %v1663_v27 }
 0x185   : > { %v2431_v30 = vpop.eup %2430  ;;  %v1410_v31 = vmul.f32 %v1378_v28, %v1378_v28  ;;  %v1537_v62 = vmul.f32 0.7978846, %v1505_v52 }
 0x186   : > { %v1600_v32 = vadd.f32 1.0, %v2431_v30 }
 0x187   : > { %v1442_v35 = vmul.f32 %v1410_v31, %v1378_v28  ;;  %2434 = vtanh.f32 %v1537_v62 }
 0x188   : > { %v1096_v36 = vpop.f32.mrf.mxu1  ;;  %v1632_v56 = vmul.f32 0.5, %v1600_v32 }
 0x189   : > { %v1474_v37 = vmul.f32 0.044715, %v1442_v35  ;;  %v1309_v38 = vadd.f32 %v3142_v23, %v1096_v36  ;;  %v732_v24 = vpop.f32.mrf.mxu0 }
 0x18a   : > { %v2433_v40 = vpop.eup %2432  ;;  %v733_v29 = vadd.f32 %v2480_v25, %v732_v24  ;;  %v1664_v41 = vmul.f32 %v1632_v56, %v1376_v48 }
 0x18b   : > { %v1379_v44 = vadd.f32 %v2976_v18, %v1309_v38  ;;  %2221 = vmatmul.msk.f32.gmra.mxu1 %vm939_vm3, %v2433_v40  ;;  %v1506_v20 = vadd.f32 %v1474_v37, %v1378_v28  ;;  %v1329_v32 = vpop.f32.mrf.mxu2 }
 0x18c   : > { %2436 = vtanh.f32 %v733_v29  ;;  %2267 = vmatmul.msk.f32.gmra.mxu3 %vm1690_vm4, %v1664_v41 }
 0x18d   : > { %v2435_v47 = vpop.eup %2434  ;;  %v1411_v49 = vmul.f32 %v1379_v44, %v1379_v44  ;;  %v1538_v50 = vmul.f32 0.7978846, %v1506_v20 }
 0x18e   : > { %v1601_v51 = vadd.f32 1.0, %v2435_v47 }
 0x18f   : > { %v1443_v9 = vmul.f32 %v1411_v49, %v1379_v44  ;;  %2438 = vtanh.f32 %v1538_v50 }
 0x190   : > { %v1099_v23 = vpop.f32.mrf.mxu1  ;;  %v1633_v53 = vmul.f32 0.5, %v1601_v51 }
 0x191   : > { %v1475_v54 = vmul.f32 0.044715, %v1443_v9  ;;  %v1312_v55 = vadd.f32 %v3161_v46, %v1099_v23  ;;  %v735_v58 = vpop.f32.mrf.mxu0 }
 0x192   : > { %v2437_v48 = vpop.eup %2436  ;;  %v736_v59 = vadd.f32 %v2480_v25, %v735_v58  ;;  %v1665_v60 = vmul.f32 %v1633_v53, %v1377_v10 }
 0x193   : > { %v1380_v14 = vadd.f32 %v2976_v18, %v1312_v55  ;;  %2222 = vmatmul.msk.f32.gmra.mxu1 %vm939_vm3, %v2437_v48  ;;  %v1507_v61 = vadd.f32 %v1475_v54, %v1379_v44  ;;  %v1332_v51 = vpop.f32.mrf.mxu2 }
 0x194   : > { %2440 = vtanh.f32 %v736_v59  ;;  %2268 = vmatmul.msk.f32.gmra.mxu3 %vm1690_vm4, %v1665_v60 }
 0x195   : > { %v2439_v16 = vpop.eup %2438  ;;  %v1412_v0 = vmul.f32 %v1380_v14, %v1380_v14  ;;  %v1539_v1 = vmul.f32 0.7978846, %v1507_v61 }
 0x196   : > { %v1602_v45 = vadd.f32 1.0, %v2439_v16 }
 0x197   : > { %v1444_v2 = vmul.f32 %v1412_v0, %v1380_v14  ;;  %2442 = vtanh.f32 %v1539_v1 }
 0x198   : > { %v1102_v46 = vpop.f32.mrf.mxu1  ;;  %v1634_v3 = vmul.f32 0.5, %v1602_v45 }
 0x199   : > { %v1476_v34 = vmul.f32 0.044715, %v1444_v2  ;;  %v1315_v6 = vadd.f32 %v3175_v57, %v1102_v46 }
 0x19a   : > { %v2441_v7 = vpop.eup %2440  ;;  %v1666_v8 = vmul.f32 %v1634_v3, %v1378_v28 }
 0x19b   : > { %v1381_v10 = vadd.f32 %v2976_v18, %v1315_v6  ;;  %2223 = vmatmul.msk.f32.gmra.mxu1 %vm939_vm3, %v2441_v7  ;;  %v1508_v33 = vadd.f32 %v1476_v34, %v1380_v14 }
 0x19c   : > { %2269 = vmatmul.msk.f32.gmra.mxu3 %vm1690_vm4, %v1666_v8 }
 0x19d   : > { %v2443_v11 = vpop.eup %2442  ;;  %v1413_v12 = vmul.f32 %v1381_v10, %v1381_v10  ;;  %v1540_v13 = vmul.f32 0.7978846, %v1508_v33 }
 0x19e   : > { %v1603_v17 = vadd.f32 1.0, %v2443_v11 }
 0x19f   : > { %v1445_v39 = vmul.f32 %v1413_v12, %v1381_v10  ;;  %2444 = vtanh.f32 %v1540_v13  ;;  %v2481_v13 = vld [vmem:[%s2750_s12] sm:$0xff] }
 0x1a0   : > { %v1105_v19 = vpop.f32.mrf.mxu1  ;;  %v1635_v42 = vmul.f32 0.5, %v1603_v17 }
 0x1a1   : > { %v1477_v63 = vmul.f32 0.044715, %v1445_v39  ;;  %v1318_v57 = vadd.f32 %v3183_v21, %v1105_v19 }
 0x1a2   : > { %v1667_v22 = vmul.f32 %v1635_v42, %v1379_v44 }
 0x1a3   : > { %v1382_v5 = vadd.f32 %v2976_v18, %v1318_v57  ;;  %v1509_v25 = vadd.f32 %v1477_v63, %v1381_v10 }
 0x1a4   : > { %2270 = vmatmul.msk.f32.gmra.mxu3 %vm1690_vm4, %v1667_v22 }
 0x1a5   : > { %v2445_v26 = vpop.eup %2444  ;;  %v1414_v27 = vmul.f32 %v1382_v5, %v1382_v5  ;;  %v1541_v28 = vmul.f32 0.7978846, %v1509_v25  ;;  %v2482_v25 = vld [vmem:[%s2750_s12 + $0x8] sm:$0xff] }
 0x1a6   : > { %v1604_v52 = vadd.f32 1.0, %v2445_v26 }
 0x1a7   : > { %v1446_v30 = vmul.f32 %v1414_v27, %v1382_v5  ;;  %2446 = vtanh.f32 %v1541_v28 }
 0x1a8   : > { %v1108_v31 = vpop.f32.mrf.mxu1  ;;  %v1636_v62 = vmul.f32 0.5, %v1604_v52 }
 0x1a9   : > { %v1478_v35 = vmul.f32 0.044715, %v1446_v30  ;;  %v1321_v36 = vadd.f32 %v3194_v43, %v1108_v31  ;;  %v1335_v0 = vpop.f32.mrf.mxu2 }
 0x1aa   : > { %v1668_v56 = vmul.f32 %v1636_v62, %v1380_v14 }
 0x1ab   : > { %v1383_v21 = vadd.f32 %v2976_v18, %v1321_v36  ;;  %v1510_v37 = vadd.f32 %v1478_v35, %v1382_v5 }
 0x1ac   : > { %2271 = vmatmul.msk.f32.gmra.mxu3 %vm1690_vm4, %v1668_v56 }
 0x1ad   : > { %v2447_v38 = vpop.eup %2446  ;;  %v1415_v24 = vmul.f32 %v1383_v21, %v1383_v21  ;;  %v1542_v40 = vmul.f32 0.7978846, %v1510_v37 }
 0x1ae   : > { %v1605_v29 = vadd.f32 1.0, %v2447_v38 }
 0x1af   : > { %v1447_v41 = vmul.f32 %v1415_v24, %v1383_v21  ;;  %2448 = vtanh.f32 %v1542_v40 }
 0x1b0   : > { %v1111_v44 = vpop.f32.mrf.mxu1  ;;  %v1637_v20 = vmul.f32 0.5, %v1605_v29 }
 0x1b1   : > { %v1479_v47 = vmul.f32 0.044715, %v1447_v41  ;;  %v1324_v49 = vadd.f32 %v1323_v15, %v1111_v44  ;;  %v1338_v63 = vpop.f32.mrf.mxu2  ;;  %v2483_v44 = vld [vmem:[%s2750_s12 + $0x10] sm:$0xff] }
 0x1b2   : > { %v1669_v50 = vmul.f32 %v1637_v20, %v1381_v10 }
 0x1b3   : > { %v1384_v43 = vadd.f32 %v2976_v18, %v1324_v49  ;;  %v1511_v9 = vadd.f32 %v1479_v47, %v1383_v21 }
 0x1b4   : > { %2272 = vmatmul.msk.f32.gmra.mxu3 %vm1690_vm4, %v1669_v50 }
 0x1b5   : > { %v2449_v23 = vpop.eup %2448  ;;  %v1416_v53 = vmul.f32 %v1384_v43, %v1384_v43  ;;  %v1543_v54 = vmul.f32 0.7978846, %v1511_v9 }
 0x1b6   : > { %v1606_v55 = vadd.f32 1.0, %v2449_v23 }
 0x1b7   : > { %v1448_v58 = vmul.f32 %v1416_v53, %v1384_v43  ;;  %2450 = vtanh.f32 %v1543_v54 }
 0x1b8   : > { %v1114_v48 = vpop.f32.mrf.mxu1  ;;  %v1638_v59 = vmul.f32 0.5, %v1606_v55 }
 0x1b9   : > { %v1480_v60 = vmul.f32 0.044715, %v1448_v58  ;;  %v1327_v14 = vadd.f32 %v1326_v4, %v1114_v48  ;;  %v1341_v50 = vpop.f32.mrf.mxu2 }
 0x1ba   : > { %v1670_v61 = vmul.f32 %v1638_v59, %v1382_v5 }
 0x1bb   : > { %v1385_v15 = vadd.f32 %v2976_v18, %v1327_v14  ;;  %v1512_v16 = vadd.f32 %v1480_v60, %v1384_v43 }
 0x1bc   : > { %2273 = vmatmul.msk.f32.gmra.mxu3 %vm1690_vm4, %v1670_v61 }
 0x1bd   : > { %v2451_v1 = vpop.eup %2450  ;;  %v1417_v45 = vmul.f32 %v1385_v15, %v1385_v15  ;;  %v1544_v2 = vmul.f32 0.7978846, %v1512_v16 }
 0x1be   : > { %v1607_v46 = vadd.f32 1.0, %v2451_v1  ;;  %v2484_v1 = vld [vmem:[%s2750_s12 + $0x18] sm:$0xff] }
 0x1bf   : > { %v1449_v3 = vmul.f32 %v1417_v45, %v1385_v15  ;;  %v1804_v34 = vpop.f32.mrf.mxu3  ;;  %2452 = vtanh.f32 %v1544_v2 }
 0x1c0   : > { %v1117_v6 = vpop.f32.mrf.mxu1  ;;  %v1639_v7 = vmul.f32 0.5, %v1607_v46  ;;  %v1901_v17 = vsub.f32 %v2481_v13, %v1804_v34 }
 0x1c1   : > { %v1481_v8 = vmul.f32 0.044715, %v1449_v3  ;;  %v1330_v10 = vadd.f32 %v1329_v32, %v1117_v6  ;;  %v1344_v6 = vpop.f32.mrf.mxu2 }
 0x1c2   : > { %v1671_v33 = vmul.f32 %v1639_v7, %v1383_v21  ;;  %v1933_v5 = vand.u32 2147483647, %v1901_v17 }
 0x1c3   : > { %v3218_v11 = vadd.f32 %v2976_v18, %v1330_v10  ;;  %v1513_v12 = vadd.f32 %v1481_v8, %v1385_v15 }
 0x1c4   : > { %2274 = vmatmul.msk.f32.gmra.mxu3 %vm1690_vm4, %v1671_v33  ;;  %v1965_v36 = vsel %vm524_vm1, %v1933_v5, 0.0 }
 0x1c5   : > { %v2453_v4 = vpop.eup %2452  ;;  %v1418_v39 = vmul.f32 %v3218_v11, %v3218_v11  ;;  %v1545_v19 = vmul.f32 0.7978846, %v1513_v12 }
 0x1c6   : > { %v1608_v42 = vadd.f32 1.0, %v2453_v4 }
 0x1c7   : > { %v1450_v57 = vmul.f32 %v1418_v39, %v3218_v11  ;;  %v1807_v22 = vpop.f32.mrf.mxu3  ;;  %2454 = vtanh.f32 %v1545_v19 }
 0x1c8   : > { %v1902_v26 = vsub.f32 %v2482_v25, %v1807_v22  ;;  %v1120_v27 = vpop.f32.mrf.mxu1  ;;  %v1640_v28 = vmul.f32 0.5, %v1608_v42  ;;  %v2485_v42 = vld [vmem:[%s2750_s12 + $0x20] sm:$0xff] }
 0x1c9   : > { %v1482_v52 = vmul.f32 0.044715, %v1450_v57  ;;  %v1333_v30 = vadd.f32 %v1332_v51, %v1120_v27 }
 0x1ca   : > { %v1934_v31 = vand.u32 2147483647, %v1902_v26  ;;  %v1672_v62 = vmul.f32 %v1640_v28, %v1384_v43  ;;  %v3242_v26 = vld [vmem:[%s2813_s30] ss:$0 sm:$0xff] }
 0x1cb   : > { %v1387_v32 = vadd.f32 %v2976_v18, %v1333_v30  ;;  %v1514_v35 = vadd.f32 %v1482_v52, %v3218_v11  ;;  %v1347_v30 = vpop.f32.mrf.mxu2 }
 0x1cc   : > { %v1966_v56 = vsel %vm524_vm1, %v1934_v31, 0.0  ;;  %2275 = vmatmul.msk.f32.gmra.mxu3 %vm1690_vm4, %v1672_v62 }
 0x1cd   : > { %v2455_v21 = vpop.eup %2454  ;;  %v1967_v37 = vadd.f32 %v1966_v56, %v1965_v36  ;;  %v1419_v38 = vmul.f32 %v1387_v32, %v1387_v32  ;;  %v1546_v24 = vmul.f32 0.7978846, %v1514_v35 }
 0x1ce   : > { %v1609_v40 = vadd.f32 1.0, %v2455_v21 }
 0x1cf   : > { %v1451_v29 = vmul.f32 %v1419_v38, %v1387_v32  ;;  %v1810_v41 = vpop.f32.mrf.mxu3  ;;  %2456 = vtanh.f32 %v1546_v24  ;;  %v2487_v38 = vld [vmem:[%s2750_s12 + $0x28] sm:$0xff] }
 0x1d0   : > { %v1903_v20 = vsub.f32 %v2483_v44, %v1810_v41  ;;  %v1123_v47 = vpop.f32.mrf.mxu1  ;;  %v1641_v49 = vmul.f32 0.5, %v1609_v40 }
 0x1d1   : > { %v1483_v51 = vmul.f32 0.044715, %v1451_v29  ;;  %v1336_v43 = vadd.f32 %v1335_v0, %v1123_v47 }
 0x1d2   : > { %v1935_v9 = vand.u32 2147483647, %v1903_v20  ;;  %v1673_v23 = vmul.f32 %v1641_v49, %v1385_v15 }
 0x1d3   : > { %v1388_v53 = vadd.f32 %v2976_v18, %v1336_v43  ;;  %v1515_v54 = vadd.f32 %v1483_v51, %v1387_v32 }
 0x1d4   : > { %v1968_v55 = vsel %vm524_vm1, %v1935_v9, 0.0  ;;  %2276 = vmatmul.msk.f32.gmra.mxu3 %vm1690_vm4, %v1673_v23 }
 0x1d5   : > { %v2457_v58 = vpop.eup %2456  ;;  %v1969_v48 = vadd.f32 %v1968_v55, %v1967_v37  ;;  %v1420_v59 = vmul.f32 %v1388_v53, %v1388_v53  ;;  %v1547_v60 = vmul.f32 0.7978846, %v1515_v54  ;;  %v1350_v55 = vpop.f32.mrf.mxu2 }
 0x1d6   : > { %v1610_v14 = vadd.f32 1.0, %v2457_v58 }
 0x1d7   : > { %v1452_v61 = vmul.f32 %v1420_v59, %v1388_v53  ;;  %v1813_v16 = vpop.f32.mrf.mxu3  ;;  %2458 = vtanh.f32 %v1547_v60  ;;  %v2488_v59 = vld [vmem:[%s2750_s12 + $0x30] sm:$0xff] }
 0x1d8   : > { %v1904_v45 = vsub.f32 %v2484_v1, %v1813_v16  ;;  %v1126_v0 = vpop.f32.mrf.mxu1  ;;  %v1642_v2 = vmul.f32 0.5, %v1610_v14 }
 0x1d9   : > { %v1484_v15 = vmul.f32 0.044715, %v1452_v61  ;;  %v1339_v46 = vadd.f32 %v1338_v63, %v1126_v0 }
 0x1da   : > { %v1936_v3 = vand.u32 2147483647, %v1904_v45  ;;  %v1674_v34 = vmul.f32 %v1642_v2, %v3218_v11 }
 0x1db   : > { %v1389_v7 = vadd.f32 %v2976_v18, %v1339_v46  ;;  %v1516_v8 = vadd.f32 %v1484_v15, %v1388_v53 }
 0x1dc   : > { %v1970_v10 = vsel %vm524_vm1, %v1936_v3, 0.0  ;;  %2277 = vmatmul.msk.f32.gmra.mxu3 %vm1690_vm4, %v1674_v34 }
 0x1dd   : > { %v2459_v33 = vpop.eup %2458  ;;  %v1971_v12 = vadd.f32 %v1970_v10, %v1969_v48  ;;  %v1421_v13 = vmul.f32 %v1389_v7, %v1389_v7  ;;  %v1548_v17 = vmul.f32 0.7978846, %v1516_v8 }
 0x1de   : > { %v1611_v4 = vadd.f32 1.0, %v2459_v33 }
 0x1df   : > { %v1453_v39 = vmul.f32 %v1421_v13, %v1389_v7  ;;  %v1816_v19 = vpop.f32.mrf.mxu3  ;;  %2460 = vtanh.f32 %v1548_v17 }
 0x1e0   : > { %v1905_v63 = vsub.f32 %v2485_v42, %v1816_v19  ;;  %v1129_v11 = vpop.f32.mrf.mxu1  ;;  %v1643_v57 = vmul.f32 0.5, %v1611_v4 }
 0x1e1   : > { %v1485_v22 = vmul.f32 0.044715, %v1453_v39  ;;  %v1342_v18 = vadd.f32 %v1341_v50, %v1129_v11 }
 0x1e2   : > { %v1937_v5 = vand.u32 2147483647, %v1905_v63  ;;  %v1675_v25 = vmul.f32 %v1643_v57, %v1387_v32 }
 0x1e3   : > { %v1390_v27 = vadd.f32 %v3242_v26, %v1342_v18  ;;  %v1517_v28 = vadd.f32 %v1485_v22, %v1389_v7 }
 0x1e4   : > { %v1972_v52 = vsel %vm524_vm1, %v1937_v5, 0.0  ;;  %2278 = vmatmul.msk.f32.gmra.mxu3 %vm1690_vm4, %v1675_v25 }
 0x1e5   : > { %v2461_v31 = vpop.eup %2460  ;;  %v1973_v62 = vadd.f32 %v1972_v52, %v1971_v12  ;;  %v1422_v35 = vmul.f32 %v1390_v27, %v1390_v27  ;;  %v1549_v36 = vmul.f32 0.7978846, %v1517_v28  ;;  %v2489_v12 = vld [vmem:[%s2750_s12 + $0x38] sm:$0xff] }
 0x1e6   : > { %v1612_v56 = vadd.f32 1.0, %v2461_v31 }
 0x1e7   : > { %v1454_v21 = vmul.f32 %v1422_v35, %v1390_v27  ;;  %v1819_v37 = vpop.f32.mrf.mxu3  ;;  %2462 = vtanh.f32 %v1549_v36 }
 0x1e8   : > { %v1906_v32 = vsub.f32 %v2487_v38, %v1819_v37  ;;  %v1132_v24 = vpop.f32.mrf.mxu1  ;;  %v1644_v40 = vmul.f32 0.5, %v1612_v56 }
 0x1e9   : > { %v1486_v29 = vmul.f32 0.044715, %v1454_v21  ;;  %v1345_v41 = vadd.f32 %v1344_v6, %v1132_v24 }
 0x1ea   : > { %v1938_v44 = vand.u32 2147483647, %v1906_v32  ;;  %v1676_v20 = vmul.f32 %v1644_v40, %v1388_v53 }
 0x1eb   : > { %v1518_v47 = vadd.f32 %v1486_v29, %v1390_v27  ;;  %v1391_v49 = vadd.f32 %v3242_v26, %v1345_v41 }
 0x1ec   : > { %v1974_v50 = vsel %vm524_vm1, %v1938_v44, 0.0  ;;  %2279 = vmatmul.msk.f32.gmra.mxu3 %vm1690_vm4, %v1676_v20 }
 0x1ed   : > { %v2463_v51 = vpop.eup %2462  ;;  %v1550_v43 = vmul.f32 0.7978846, %v1518_v47  ;;  %v1975_v9 = vadd.f32 %v1974_v50, %v1973_v62  ;;  %v1423_v23 = vmul.f32 %v1391_v49, %v1391_v49  ;;  %v2490_v62 = vld [vmem:[%s2750_s12 + $0x40] sm:$0xff] }
 0x1ee   : > { %v1613_v54 = vadd.f32 1.0, %v2463_v51 }
 0x1ef   : > { %2464 = vtanh.f32 %v1550_v43  ;;  %v1455_v58 = vmul.f32 %v1423_v23, %v1391_v49  ;;  %v1822_v48 = vpop.f32.mrf.mxu3 }
 0x1f0   : > { %v1907_v60 = vsub.f32 %v2488_v59, %v1822_v48  ;;  %v1135_v14 = vpop.f32.mrf.mxu1  ;;  %v1645_v53 = vmul.f32 0.5, %v1613_v54 }
 0x1f1   : > { %v1487_v61 = vmul.f32 0.044715, %v1455_v58  ;;  %v1348_v16 = vadd.f32 %v1347_v30, %v1135_v14 }
 0x1f2   : > { %v1939_v1 = vand.u32 2147483647, %v1907_v60  ;;  %v1677_v45 = vmul.f32 %v1645_v53, %v1389_v7  ;;  %v1353_v7 = vpop.f32.mrf.mxu2 }
 0x1f3   : > { %v1519_v0 = vadd.f32 %v1487_v61, %v1391_v49  ;;  %v1392_v2 = vadd.f32 %v3242_v26, %v1348_v16 }
 0x1f4   : > { %v1976_v15 = vsel %vm524_vm1, %v1939_v1, 0.0  ;;  %2280 = vmatmul.msk.f32.gmra.mxu3 %vm1690_vm4, %v1677_v45 }
 0x1f5   : > { %v2465_v46 = vpop.eup %2464  ;;  %v1551_v3 = vmul.f32 0.7978846, %v1519_v0  ;;  %v1977_v34 = vadd.f32 %v1976_v15, %v1975_v9  ;;  %v1424_v6 = vmul.f32 %v1392_v2, %v1392_v2  ;;  %v2491_v9 = vld [vmem:[%s2750_s12 + $0x48] sm:$0xff] }
 0x1f6   : > { %v1614_v8 = vadd.f32 1.0, %v2465_v46 }
 0x1f7   : > { %2466 = vtanh.f32 %v1551_v3  ;;  %v1456_v10 = vmul.f32 %v1424_v6, %v1392_v2  ;;  %v1825_v33 = vpop.f32.mrf.mxu3 }
 0x1f8   : > { %v1908_v13 = vsub.f32 %v2489_v12, %v1825_v33  ;;  %v1138_v17 = vpop.f32.mrf.mxu1  ;;  %v1646_v4 = vmul.f32 0.5, %v1614_v8 }
 0x1f9   : > { %v1488_v39 = vmul.f32 0.044715, %v1456_v10  ;;  %v1351_v19 = vadd.f32 %v1350_v55, %v1138_v17 }
 0x1fa   : > { %v1940_v42 = vand.u32 2147483647, %v1908_v13  ;;  %v1678_v63 = vmul.f32 %v1646_v4, %v1390_v27  ;;  %v1356_v32 = vpop.f32.mrf.mxu2 }
 0x1fb   : > { %v1520_v11 = vadd.f32 %v1488_v39, %v1392_v2  ;;  %v1393_v57 = vadd.f32 %v3242_v26, %v1351_v19 }
 0x1fc   : > { %v1978_v22 = vsel %vm524_vm1, %v1940_v42, 0.0  ;;  %2281 = vmatmul.msk.f32.gmra.mxu3 %vm1690_vm4, %v1678_v63 }
 0x1fd   : > { %v2467_v18 = vpop.eup %2466  ;;  %v1552_v5 = vmul.f32 0.7978846, %v1520_v11  ;;  %v1979_v25 = vadd.f32 %v1978_v22, %v1977_v34  ;;  %v1425_v28 = vmul.f32 %v1393_v57, %v1393_v57  ;;  %v2492_v34 = vld [vmem:[%s2750_s12 + $0x50] sm:$0xff] }
 0x1fe   : > { %v1615_v52 = vadd.f32 1.0, %v2467_v18 }
 0x1ff   : > { %2468 = vtanh.f32 %v1552_v5  ;;  %v1457_v30 = vmul.f32 %v1425_v28, %v1393_v57  ;;  %v1828_v31 = vpop.f32.mrf.mxu3 }
 0x200   : > { %v1909_v35 = vsub.f32 %v2490_v62, %v1828_v31  ;;  %v1141_v36 = vpop.f32.mrf.mxu1  ;;  %v1647_v56 = vmul.f32 0.5, %v1615_v52 }
 0x201   : > { %v1489_v27 = vmul.f32 0.044715, %v1457_v30  ;;  %v1354_v21 = vadd.f32 %v1353_v7, %v1141_v36 }
 0x202   : > { %v1941_v37 = vand.u32 2147483647, %v1909_v35  ;;  %v1679_v38 = vmul.f32 %v1647_v56, %v1391_v49  ;;  %v1359_v61 = vpop.f32.mrf.mxu2 }
 0x203   : > { %v1521_v24 = vadd.f32 %v1489_v27, %v1393_v57  ;;  %v1394_v40 = vadd.f32 %v3242_v26, %v1354_v21 }
 0x204   : > { %v1980_v29 = vsel %vm524_vm1, %v1941_v37, 0.0  ;;  %2282 = vmatmul.msk.f32.gmra.mxu3 %vm1690_vm4, %v1679_v38 }
 0x205   : > { %v2469_v41 = vpop.eup %2468  ;;  %v1553_v44 = vmul.f32 0.7978846, %v1521_v24  ;;  %v1981_v20 = vadd.f32 %v1980_v29, %v1979_v25  ;;  %v1426_v47 = vmul.f32 %v1394_v40, %v1394_v40  ;;  %v2493_v25 = vld [vmem:[%s2750_s12 + $0x58] sm:$0xff] }
 0x206   : > { %v1616_v50 = vadd.f32 1.0, %v2469_v41 }
 0x207   : > { %2470 = vtanh.f32 %v1553_v44  ;;  %v1458_v51 = vmul.f32 %v1426_v47, %v1394_v40  ;;  %v1831_v43 = vpop.f32.mrf.mxu3  ;;  %v2494_v44 = vld [vmem:[%s2750_s12 + $0x60] sm:$0xff] }
 0x208   : > { %v1910_v23 = vsub.f32 %v2491_v9, %v1831_v43  ;;  %v1144_v54 = vpop.f32.mrf.mxu1  ;;  %v1648_v49 = vmul.f32 0.5, %v1616_v50 }
 0x209   : > { %v1490_v55 = vmul.f32 0.044715, %v1458_v51  ;;  %v1357_v58 = vadd.f32 %v1356_v32, %v1144_v54 }
 0x20a   : > { %v1942_v48 = vand.u32 2147483647, %v1910_v23  ;;  %v1680_v59 = vmul.f32 %v1648_v49, %v1392_v2  ;;  %v1362_v11 = vpop.f32.mrf.mxu2 }
 0x20b   : > { %v1522_v60 = vadd.f32 %v1490_v55, %v1394_v40  ;;  %v1395_v14 = vadd.f32 %v3242_v26, %v1357_v58  ;;  %v2495_v58 = vld [vmem:[%s2750_s12 + $0x68] sm:$0xff] }
 0x20c   : > { %v1982_v53 = vsel %vm524_vm1, %v1942_v48, 0.0  ;;  %2283 = vmatmul.msk.f32.gmra.mxu3 %vm1690_vm4, %v1680_v59 }
 0x20d   : > { %v2471_v16 = vpop.eup %2470  ;;  %v1554_v1 = vmul.f32 0.7978846, %v1522_v60  ;;  %v1983_v45 = vadd.f32 %v1982_v53, %v1981_v20  ;;  %v1427_v0 = vmul.f32 %v1395_v14, %v1395_v14 }
 0x20e   : > { %v1617_v15 = vadd.f32 1.0, %v2471_v16 }
 0x20f   : > { %2472 = vtanh.f32 %v1554_v1  ;;  %v1459_v46 = vmul.f32 %v1427_v0, %v1395_v14  ;;  %v1834_v3 = vpop.f32.mrf.mxu3  ;;  %v2496_v0 = vld [vmem:[%s2750_s12 + $0x70] sm:$0xff] }
 0x210   : > { %v1911_v6 = vsub.f32 %v2492_v34, %v1834_v3  ;;  %v1147_v8 = vpop.f32.mrf.mxu1  ;;  %v1649_v2 = vmul.f32 0.5, %v1617_v15 }
 0x211   : > { %v1491_v10 = vmul.f32 0.044715, %v1459_v46  ;;  %v1360_v33 = vadd.f32 %v1359_v61, %v1147_v8 }
 0x212   : > { %v1943_v12 = vand.u32 2147483647, %v1911_v6  ;;  %v1681_v13 = vmul.f32 %v1649_v2, %v1393_v57 }
 0x213   : > { %v1523_v17 = vadd.f32 %v1491_v10, %v1395_v14  ;;  %v1396_v4 = vadd.f32 %v3242_v26, %v1360_v33  ;;  %v2497_v10 = vld [vmem:[%s2750_s12 + $0x78] sm:$0xff] }
 0x214   : > { %v1984_v7 = vsel %vm524_vm1, %v1943_v12, 0.0  ;;  %2284 = vmatmul.msk.f32.gmra.mxu3 %vm1690_vm4, %v1681_v13 }
 0x215   : > { %v2473_v39 = vpop.eup %2472  ;;  %v1555_v19 = vmul.f32 0.7978846, %v1523_v17  ;;  %v1985_v42 = vadd.f32 %v1984_v7, %v1983_v45  ;;  %v1428_v63 = vmul.f32 %v1396_v4, %v1396_v4  ;;  %v2498_v7 = vld [vmem:[%s2750_s12 + $0x80] sm:$0xff] }
 0x216   : > { %v1618_v22 = vadd.f32 1.0, %v2473_v39 }
 0x217   : > { %2474 = vtanh.f32 %v1555_v19  ;;  %v1460_v18 = vmul.f32 %v1428_v63, %v1396_v4  ;;  %v1837_v5 = vpop.f32.mrf.mxu3 }
 0x218   : > { %v1912_v28 = vsub.f32 %v2493_v25, %v1837_v5  ;;  %v1150_v52 = vpop.f32.mrf.mxu1  ;;  %v1650_v57 = vmul.f32 0.5, %v1618_v22  ;;  %v2499_v22 = vld [vmem:[%s2750_s12 + $0x88] sm:$0xff] }
 0x219   : > { %v1492_v30 = vmul.f32 0.044715, %v1460_v18  ;;  %v1363_v31 = vadd.f32 %v1362_v11, %v1150_v52 }
 0x21a   : > { %v1944_v62 = vand.u32 2147483647, %v1912_v28  ;;  %v1682_v35 = vmul.f32 %v1650_v57, %v1394_v40  ;;  %v2500_v57 = vld [vmem:[%s2750_s12 + $0x90] sm:$0xff] }
 0x21b   : > { %v1524_v36 = vadd.f32 %v1492_v30, %v1396_v4  ;;  %v1397_v56 = vadd.f32 %v3242_v26, %v1363_v31 }
 0x21c   : > { %v1986_v27 = vsel %vm524_vm1, %v1944_v62, 0.0  ;;  %2285 = vmatmul.msk.f32.gmra.mxu3 %vm1690_vm4, %v1682_v35 }
 0x21d   : > { %v2475_v21 = vpop.eup %2474  ;;  %v1556_v37 = vmul.f32 0.7978846, %v1524_v36  ;;  %v1987_v38 = vadd.f32 %v1986_v27, %v1985_v42  ;;  %v1429_v32 = vmul.f32 %v1397_v56, %v1397_v56 }
 0x21e   : > { %v1619_v24 = vadd.f32 1.0, %v2475_v21 }
 0x21f   : > { %2476 = vtanh.f32 %v1556_v37  ;;  %v1461_v29 = vmul.f32 %v1429_v32, %v1397_v56  ;;  %v1840_v41 = vpop.f32.mrf.mxu3 }
 0x220   : > { %v1913_v20 = vsub.f32 %v2494_v44, %v1840_v41  ;;  %v1651_v47 = vmul.f32 0.5, %v1619_v24  ;;  %v2502_v24 = vld [vmem:[%s2750_s12 + $0xa0] sm:$0xff] }
 0x221   : > { %v1493_v40 = vmul.f32 0.044715, %v1461_v29 }
 0x222   : > { %v1945_v50 = vand.u32 2147483647, %v1913_v20  ;;  %v1683_v51 = vmul.f32 %v1651_v47, %v1395_v14 }
 0x223   : > { %v1525_v26 = vadd.f32 %v1493_v40, %v1397_v56 }
 0x224   : > { %v1988_v43 = vsel %vm524_vm1, %v1945_v50, 0.0  ;;  %2286 = vmatmul.msk.f32.gmra.mxu3 %vm1690_vm4, %v1683_v51 }
 0x225   : > { %v2477_v9 = vpop.eup %2476  ;;  %v1557_v23 = vmul.f32 0.7978846, %v1525_v26  ;;  %v1989_v54 = vadd.f32 %v1988_v43, %v1987_v38 }
 0x226   : > { %v1620_v49 = vadd.f32 1.0, %v2477_v9 }
 0x227   : > { %2478 = vtanh.f32 %v1557_v23  ;;  %v1843_v55 = vpop.f32.mrf.mxu3  ;;  %v2503_v23 = vld [vmem:[%s2750_s12 + $0xa8] sm:$0xff] }
 0x228   : > { %v1914_v48 = vsub.f32 %v2495_v58, %v1843_v55  ;;  %v1652_v59 = vmul.f32 0.5, %v1620_v49  ;;  %v2504_v55 = vld [vmem:[%s2750_s12 + $0xb0] sm:$0xff] }
 0x22a   : > { %v1946_v60 = vand.u32 2147483647, %v1914_v48  ;;  %v1684_v53 = vmul.f32 %v1652_v59, %v1396_v4  ;;  %v2505_v59 = vld [vmem:[%s2750_s12 + $0xb8] sm:$0xff] }
 0x22c   : > { %v1990_v14 = vsel %vm524_vm1, %v1946_v60, 0.0  ;;  %2287 = vmatmul.msk.f32.gmra.mxu3 %vm1690_vm4, %v1684_v53 }
 0x22d   : > { %v2479_v61 = vpop.eup %2478  ;;  %v1991_v16 = vadd.f32 %v1990_v14, %v1989_v54  ;;  %v2506_v14 = vld [vmem:[%s2750_s12 + $0xc0] sm:$0xff] }
 0x22e   : > { %v1621_v1 = vadd.f32 1.0, %v2479_v61 }
 0x22f   : > { %v1846_v45 = vpop.f32.mrf.mxu3 }
 0x230   : > { %v1915_v15 = vsub.f32 %v2496_v0, %v1846_v45  ;;  %v1653_v46 = vmul.f32 0.5, %v1621_v1  ;;  %v2507_v45 = vld [vmem:[%s2750_s12 + $0xc8] sm:$0xff] }
 0x232   : > { %v1947_v3 = vand.u32 2147483647, %v1915_v15  ;;  %v1685_v34 = vmul.f32 %v1653_v46, %v1397_v56  ;;  %v2501_v56 = vld [vmem:[%s2750_s12 + $0x98] sm:$0xff] }
 0x234   : > { %v1992_v6 = vsel %vm524_vm1, %v1947_v3, 0.0  ;;  %2288 = vmatmul.msk.f32.gmra.mxu3 %vm1690_vm4, %v1685_v34  ;;  %v2508_v34 = vld [vmem:[%s2750_s12 + $0xd0] sm:$0xff] }
 0x235   : > { %v1993_v8 = vadd.f32 %v1992_v6, %v1991_v16 }
 0x237   : > { %v1849_v2 = vpop.f32.mrf.mxu3 }
 0x238   : > { %v1916_v33 = vsub.f32 %v2497_v10, %v1849_v2 }
 0x23a   : > { %v1948_v12 = vand.u32 2147483647, %v1916_v33  ;;  %v2509_v33 = vld [vmem:[%s2750_s12 + $0xd8] sm:$0xff] }
 0x23c   : > { %v1994_v13 = vsel %vm524_vm1, %v1948_v12, 0.0 }
 0x23d   : > { %v1995_v17 = vadd.f32 %v1994_v13, %v1993_v8 }
 0x23f   : > { %v1852_v4 = vpop.f32.mrf.mxu3 }
 0x240   : > { %v1917_v39 = vsub.f32 %v2498_v7, %v1852_v4  ;;  %v2510_v7 = vld [vmem:[%s2750_s12 + $0xe0] sm:$0xff] }
 0x242   : > { %v1949_v19 = vand.u32 2147483647, %v1917_v39 }
 0x244   : > { %v1996_v42 = vsel %vm524_vm1, %v1949_v19, 0.0 }
 0x245   : > { %v1997_v63 = vadd.f32 %v1996_v42, %v1995_v17 }
 0x247   : > { %v1855_v11 = vpop.f32.mrf.mxu3 }
 0x248   : > { %v1918_v18 = vsub.f32 %v2499_v22, %v1855_v11  ;;  %v2511_v11 = vld [vmem:[%s2750_s12 + $0xe8] sm:$0xff] }
 0x24a   : > { %v1950_v5 = vand.u32 2147483647, %v1918_v18 }
 0x24c   : > { %v1998_v25 = vsel %vm524_vm1, %v1950_v5, 0.0 }
 0x24d   : > { %v1999_v28 = vadd.f32 %v1998_v25, %v1997_v63 }
 0x24f   : > { %v1858_v52 = vpop.f32.mrf.mxu3 }
 0x250   : > { %v1919_v30 = vsub.f32 %v2500_v57, %v1858_v52  ;;  %v2512_v52 = vld [vmem:[%s2750_s12 + $0xf0] sm:$0xff] }
 0x252   : > { %v1951_v31 = vand.u32 2147483647, %v1919_v30 }
 0x254   : > { %v2000_v62 = vsel %vm524_vm1, %v1951_v31, 0.0 }
 0x255   : > { %v2001_v35 = vadd.f32 %v2000_v62, %v1999_v28 }
 0x257   : > { %v1861_v36 = vpop.f32.mrf.mxu3 }
 0x258   : > { %v1920_v27 = vsub.f32 %v2501_v56, %v1861_v36 }
 0x25a   : > { %v1952_v21 = vand.u32 2147483647, %v1920_v27 }
 0x25c   : > { %v2002_v37 = vsel %vm524_vm1, %v1952_v21, 0.0 }
 0x25d   : > { %v2003_v38 = vadd.f32 %v2002_v37, %v2001_v35 }
 0x25f   : > { %v1864_v32 = vpop.f32.mrf.mxu3 }
 0x260   : > { %v1921_v29 = vsub.f32 %v2502_v24, %v1864_v32  ;;  %v2513_v32 = vld [vmem:[%s2750_s12 + $0xf8] sm:$0xff]  ;;  %s1900_s12 = sld [smem:[#allocation7]] }
 0x262   : > { %v1953_v41 = vand.u32 2147483647, %v1921_v29 }
 0x264   : > { %v2004_v44 = vsel %vm524_vm1, %v1953_v41, 0.0 }
 0x265   : > { %v2005_v20 = vadd.f32 %v2004_v44, %v2003_v38 }
 0x267   : > { %v1867_v47 = vpop.f32.mrf.mxu3 }
 0x268   : > { %v1922_v54 = vsub.f32 %v2503_v23, %v1867_v47 }
 0x26a   : > { %v1954_v48 = vand.u32 2147483647, %v1922_v54 }
 0x26c   : > { %v2006_v16 = vsel %vm524_vm1, %v1954_v48, 0.0 }
 0x26d   : > { %v2007_v8 = vadd.f32 %v2006_v16, %v2005_v20 }
 0x26f   : > { %v1870_v40 = vpop.f32.mrf.mxu3 }
 0x270   : > { %v1923_v58 = vsub.f32 %v2504_v55, %v1870_v40 }
 0x272   : > { %v1955_v53 = vand.u32 2147483647, %v1923_v58 }
 0x274   : > { %v2008_v46 = vsel %vm524_vm1, %v1955_v53, 0.0 }
 0x275   : > { %v2009_v13 = vadd.f32 %v2008_v46, %v2007_v8 }
 0x277   : > { %v1873_v50 = vpop.f32.mrf.mxu3 }
 0x278   : > { %v1924_v60 = vsub.f32 %v2505_v59, %v1873_v50 }
 0x27a   : > { %v1956_v1 = vand.u32 2147483647, %v1924_v60 }
 0x27c   : > { %v2010_v2 = vsel %vm524_vm1, %v1956_v1, 0.0 }
 0x27d   : > { %v2011_v19 = vadd.f32 %v2010_v2, %v2009_v13 }
 0x27f   : > { %v1876_v51 = vpop.f32.mrf.mxu3 }
 0x280   : > { %v1925_v61 = vsub.f32 %v2506_v14, %v1876_v51 }
 0x282   : > { %v1957_v3 = vand.u32 2147483647, %v1925_v61 }
 0x284   : > { %v2012_v17 = vsel %vm524_vm1, %v1957_v3, 0.0 }
 0x285   : > { %v2013_v18 = vadd.f32 %v2012_v17, %v2011_v19 }
 0x287   : > { %v1879_v26 = vpop.f32.mrf.mxu3 }
 0x288   : > { %v1926_v0 = vsub.f32 %v2507_v45, %v1879_v26 }
 0x28a   : > { %v1958_v10 = vand.u32 2147483647, %v1926_v0 }
 0x28c   : > { %v2014_v42 = vsel %vm524_vm1, %v1958_v10, 0.0 }
 0x28d   : > { %v2015_v30 = vadd.f32 %v2014_v42, %v2013_v18 }
 0x28f   : > { %v1882_v43 = vpop.f32.mrf.mxu3 }
 0x290   : > { %v1927_v6 = vsub.f32 %v2508_v34, %v1882_v43 }
 0x292   : > { %v1959_v4 = vand.u32 2147483647, %v1927_v6 }
 0x294   : > { %v2016_v25 = vsel %vm524_vm1, %v1959_v4, 0.0 }
 0x295   : > { %v2017_v35 = vadd.f32 %v2016_v25, %v2015_v30 }
 0x297   : > { %v1885_v9 = vpop.f32.mrf.mxu3 }
 0x298   : > { %v1928_v12 = vsub.f32 %v2509_v33, %v1885_v9 }
 0x29a   : > { %v1960_v63 = vand.u32 2147483647, %v1928_v12 }
 0x29c   : > { %v2018_v31 = vsel %vm524_vm1, %v1960_v63, 0.0 }
 0x29d   : > { %v2019_v27 = vadd.f32 %v2018_v31, %v2017_v35 }
 0x29f   : > { %v1888_v49 = vpop.f32.mrf.mxu3 }
 0x2a0   : > { %v1929_v39 = vsub.f32 %v2510_v7, %v1888_v49 }
 0x2a2   : > { %v1961_v28 = vand.u32 2147483647, %v1929_v39 }
 0x2a4   : > { %v2020_v36 = vsel %vm524_vm1, %v1961_v28, 0.0 }
 0x2a5   : > { %v2021_v37 = vadd.f32 %v2020_v36, %v2019_v27 }
 0x2a7   : > { %v1891_v15 = vpop.f32.mrf.mxu3 }
 0x2a8   : > { %v1930_v22 = vsub.f32 %v2511_v11, %v1891_v15 }
 0x2aa   : > { %v1962_v62 = vand.u32 2147483647, %v1930_v22 }
 0x2ac   : > { %v2022_v21 = vsel %vm524_vm1, %v1962_v62, 0.0 }
 0x2ad   : > { %v2023_v41 = vadd.f32 %v2022_v21, %v2021_v37 }
 0x2af   : > { %v1894_v5 = vpop.f32.mrf.mxu3 }
 0x2b0   : > { %v1931_v57 = vsub.f32 %v2512_v52, %v1894_v5 }
 0x2b2   : > { %v1963_v56 = vand.u32 2147483647, %v1931_v57 }
 0x2b4   : > { %v2024_v29 = vsel %vm524_vm1, %v1963_v56, 0.0 }
 0x2b5   : > { %v2025_v20 = vadd.f32 %v2024_v29, %v2023_v41 }
 0x2b7   : > { %v1897_v38 = vpop.f32.mrf.mxu3 }
 0x2b8   : > { %v1932_v24 = vsub.f32 %v2513_v32, %v1897_v38 }
 0x2ba   : > { %v1964_v44 = vand.u32 2147483647, %v1932_v24 }
 0x2bc   : > { %v2026_v47 = vsel %vm524_vm1, %v1964_v44, 0.0 }
 0x2bd   : > { %v2027_v40 = vadd.f32 %v2026_v47, %v2025_v20 }
 0x2bf   : > { %2028 = vadd.xlane.f32.xlu0 %v2027_v40 }
 0x332   : > { %v2029_v50 = vpop.xlane.xlu0 %2028 }
 0x333   : > { %v2030_v51 = vrot.slane %v2029_v50, 4 }
 0x335   : > { %v2031_v26 = vadd.f32 %v2030_v51, %v2029_v50 }
 0x337   : > { %v2032_v43 = vrot.slane %v2031_v26, 2 }
 0x339   : > { %v2033_v9 = vadd.f32 %v2032_v43, %v2031_v26 }
 0x33b   : > { %v2034_v23 = vrot.slane %v2033_v9, 1 }
 0x33d   : > { %v2035_v54 = vadd.f32 %v2034_v23, %v2033_v9 }
 0x33f   : > { %2294 = vpush %v2035_v54 }
 0x370   : > { %s2295_s14 = spop %2294 }
 0x371   : > { %s2037_s17 = sadd.f32 %s2295_s14, %s1900_s12 }
 0x373   : > { %2039 = sst [smem:[#allocation7]] %s2037_s17 }
 0x374   : > { %2306 = dma.smem_to_hbm (%p2320_p9), %s2597_s22, 16, %s2047_s13, [#allocation3]  }
 0x375   : > { %2579 = dma.done.wait (%p2320_p9), [#allocation3], 16  }
 0x376   : > { %2581 = vsyncadd (%p2320_p9), [#allocation3], 4294967280 }
 0x377   : > { %2055 = sfence }
 0x378 PF: > { %s24_s19 = sadd.s32 1, %s2592_s19   ;;  %s3346_s17 = smov %s2588_s18 }
 0x379   : > { %p21_p10 = scmp.ge.s32.totalorder %s24_s19, 6   ;;  %s3347_s18 = smov %s3349_s21 }
 0x37b   :  { %23 = sbr.rel (!%p21_p10) target bundleno = 4 (0x4), region = 113 }
 0x380   :  { %2061 = vsyncpa [#allocation3], 1 }
 0x381   :  { %2063 = vsyncpa [#allocation3 + $0x1], 1 }
 0x382   :  { %2064 = vsyncpa [#allocation4], 1 }
 0x383   :  { %2066 = vsyncpa [#allocation4 + $0x1], 1 }
 0x384   :  { %2067 = vsyncpa [#allocation6], 1 }

</bundles_post_ra>
